<compile_context>
chip_gen: v7x
topology: tpu7x:2x2x1
jax: 0.10.0
libtpu: 0.0.40
codegen_flags: <defaults>
</compile_context>

<pallas_src>
import functools
import re

import numpy as np
import jax
import jax.numpy as jnp
from jax.experimental import pallas as pl
from jax.experimental.pallas import tpu as pltpu


def _interp_matrix(n_in, n_out, align_corners):
    """(n_out, n_in) 1-D linear-interpolation matrix matching
    torch.nn.functional.interpolate(mode='linear'/'bilinear')."""
    if n_out == 1:
        if align_corners:
            src = np.zeros((1,), dtype=np.float64)
        else:
            src = np.array([max(0.0, 0.5 * (n_in / n_out) - 0.5)], dtype=np.float64)
    elif align_corners:
        src = np.arange(n_out, dtype=np.float64) * (n_in - 1) / (n_out - 1)
    else:
        src = (np.arange(n_out, dtype=np.float64) + 0.5) * (n_in / n_out) - 0.5
        src = np.maximum(src, 0.0)          # torch clamps negative source idx
    lo = np.clip(np.floor(src).astype(np.int64), 0, n_in - 1)
    hi = np.clip(lo + 1, 0, n_in - 1)
    w_hi = src - lo
    w_lo = 1.0 - w_hi
    mat = np.zeros((n_out, n_in), dtype=np.float64)
    mat[np.arange(n_out), lo] += w_lo
    mat[np.arange(n_out), hi] += w_hi
    return mat.astype(np.float32)


# --------------------------------------------------------------------------
# Kernels
# --------------------------------------------------------------------------

def _upsample_kernel_fused(wht_ref, wwt_ref, x_ref, o_ref, *, round_output=False):
    # wht_ref: (H, Ho)   Wh^T, resident in VMEM across grid steps
    # wwt_ref: (W, Wo)   Ww^T, resident in VMEM across grid steps
    # x_ref:   (TB, H, W)  input slab     o_ref: (TB, Ho, Wo) output slab
    tb, h, w = x_ref.shape
    ho = wht_ref.shape[1]
    wo = wwt_ref.shape[1]
    cdt = wwt_ref.dtype

    x = x_ref[...].astype(cdt)
    # H-pass, one MXU matmul over all TB*W columns:
    #   (TB*W, H) @ (H, Ho) -> (TB*W, Ho)       [swapaxes runs on the XLU]
    xt = jnp.swapaxes(x, 1, 2).reshape(tb * w, h)
    t = jnp.dot(xt, wht_ref[...], preferred_element_type=jnp.float32)
    # Back to (TB*Ho, W) for the W-pass.
    t = jnp.swapaxes(t.reshape(tb, w, ho), 1, 2).reshape(tb * ho, w).astype(cdt)
    # W-pass, one MXU matmul: (TB*Ho, W) @ (W, Wo) -> (TB*Ho, Wo)
    y = jnp.dot(t, wwt_ref[...], preferred_element_type=jnp.float32)
    if round_output:
        y = jnp.rint(y)
    o_ref[...] = y.reshape(tb, ho, wo).astype(o_ref.dtype)


def _upsample_kernel_loop(wht_ref, wwt_ref, x_ref, o_ref, *, round_output=False):
    # Proven fallback path (small per-slab H-pass matmuls, statically unrolled).
    tb, h, w = x_ref.shape
    cdt = wwt_ref.dtype
    x = x_ref[...].astype(cdt)
    tmp = jnp.dot(x.reshape(tb * h, w), wwt_ref[...],
                  preferred_element_type=jnp.float32)
    tmp = tmp.reshape(tb, h, -1).astype(cdt)
    wh = wht_ref[...].T                       # (Ho, H), hoisted out of the loop
    for b in range(tb):
        y = jnp.dot(wh, tmp[b], preferred_element_type=jnp.float32)
        if round_output:
            y = jnp.rint(y)
        o_ref[b] = y.astype(o_ref.dtype)


# --------------------------------------------------------------------------
# Block/grid sizing
# --------------------------------------------------------------------------

def _tpu_params():
    """(vmem_capacity_bytes, tensorcores sharing the parallel grid axis)."""
    vmem = 64 << 20                       # conservative default (v7x per-core VMEM)
    try:
        vmem = int(pltpu.get_tpu_info().vmem_capacity_bytes)
    except Exception:
        pass
    n_cores = 1
    try:
        kind = jax.devices()[0].device_kind
        m = re.search(r"(\d+)", kind)
        if m:
            g = int(m.group(1))
            lite = ("lite" in kind.lower()) or kind.lower().rstrip().endswith("e")
            if g == 4 or (g == 5 and not lite) or g >= 7:
                n_cores = 2               # megacore / v7x: 2 TCs share the grid
    except Exception:
        pass
    return vmem, n_cores


def _pick_block_batch(bc, h, w, ho, wo, xi, wi, vmem, n_cores):
    """Slabs per grid step: largest divisor of bc fitting the VMEM budget,
    then (if cheap) split for pipelining / TensorCore sharding."""
    budget = int(vmem * (0.40 if vmem <= (64 << 20) else 0.55))
    # Weights counted double-buffered (conservative; Buffered(1) only adds slack).
    weight_bytes = 2 * (ho * h + w * wo) * wi
    per_slab = (2 * (h * w + ho * wo) * xi      # double-buffered in/out blocks
                + 2 * h * w * wi                # cast + transposed input copies
                + ho * w * (4 + wi)             # H-pass f32 result + cast/transpose
                + ho * wo * (4 + xi))           # W-pass f32 result + final cast
    tb_cap = max(1, (budget - weight_bytes) // per_slab)
    divisors = [d for d in range(1, bc + 1) if bc % d == 0]
    fits = [d for d in divisors if d <= tb_cap] or [1]
    tb = max(fits)                              # fill VMEM, minimize grid steps

    # Prefer >= 2 steps per TensorCore (pipelining + core sharding) as long as
    # the per-step x slab stays reasonably large (>= ~512 KiB).
    slab_bytes = h * w * xi
    min_step_bytes = 512 << 10
    cand = [d for d in fits
            if (bc // d) >= 2 * n_cores
            and (bc // d) % n_cores == 0
            and d * slab_bytes >= min(min_step_bytes, tb * slab_bytes)]
    if cand:
        tb = max(cand)
    return tb


# --------------------------------------------------------------------------
# Wrapper
# --------------------------------------------------------------------------

def upsample(image, factor=None, shape=None, anchor='center', compute_dtype=None):
    """image: (B, C, H, W) -> (B, C, Ho, Wo) bilinear resample."""
    B, C, H, W = image.shape
    if shape is not None:
        Ho, Wo = int(shape[0]), int(shape[1])
    else:
        f = factor if factor is not None else 2
        if isinstance(f, (tuple, list)):
            fh, fw = f
        else:
            fh = fw = f
        Ho, Wo = int(H * fh), int(W * fw)
    align_corners = str(anchor)[:1].lower() == 'c'

    if compute_dtype is None:
        compute_dtype = jnp.bfloat16 if image.dtype == jnp.bfloat16 else jnp.float32
    compute_dtype = jnp.dtype(compute_dtype)
    round_output = not jnp.issubdtype(image.dtype, jnp.floating)

    # Pre-transposed weights: Wh^T (H, Ho), Ww^T (W, Wo).
    wht = jnp.asarray(_interp_matrix(H, Ho, align_corners).T, dtype=compute_dtype)
    wwt = jnp.asarray(_interp_matrix(W, Wo, align_corners).T, dtype=compute_dtype)

    bc = B * C
    vmem, n_cores = _tpu_params()
    tb = _pick_block_batch(bc, H, W, Ho, Wo,
                           jnp.dtype(image.dtype).itemsize,
                           compute_dtype.itemsize, vmem, n_cores)

    x = image.reshape(bc, H, W)
    vmem_limit = max(32 << 20, min(int(vmem * 0.85), 100 * 1024 * 1024))

    def _run(fused, single_buffer_weights):
        kernel = _upsample_kernel_fused if fused else _upsample_kernel_loop
        kernel = functools.partial(kernel, round_output=round_output)
        w_kw = {"pipeline_mode": pl.Buffered(1)} if single_buffer_weights else {}
        in_specs = [
            pl.BlockSpec((H, Ho), lambda i: (0, 0), **w_kw),         # Wh^T resident
            pl.BlockSpec((W, Wo), lambda i: (0, 0), **w_kw),         # Ww^T resident
            pl.BlockSpec((tb, H, W), lambda i: (i, 0, 0)),           # input slabs
        ]
        out = pl.pallas_call(
            kernel,
            out_shape=jax.ShapeDtypeStruct((bc, Ho, Wo), image.dtype),
            grid_spec=pltpu.PrefetchScalarGridSpec(
                num_scalar_prefetch=0,
                grid=(bc // tb,),
                in_specs=in_specs,
                out_specs=pl.BlockSpec((tb, Ho, Wo), lambda i: (i, 0, 0)),
            ),
            compiler_params=pltpu.CompilerParams(
                dimension_semantics=("parallel",),
                vmem_limit_bytes=vmem_limit),
        )(wht, wwt, x)
        # Force compile/runtime errors to surface inside the try block.
        return jax.block_until_ready(out)

    # Defensive fallbacks (fused+single-buffered -> fused -> proven loop kernel).
    attempts = ((True, True), (True, False), (False, False))
    out, err = None, None
    for fused, sb in attempts:
        try:
            out = _run(fused, sb)
            break
        except Exception as e:      # pragma: no cover - lowering fallback
            err = e
    if out is None:
        raise err
    return out.reshape(B, C, Ho, Wo)


class Upsample:
    """Upsample a tensor using corners as anchors (Pallas/TPU port)."""

    def __init__(self, factor=2, anchor='center'):
        self.factor = factor
        self.anchor = anchor

    def __call__(self, image, shape=None):
        factor = None if shape else self.factor
        return upsample(image, factor, shape, self.anchor)


if __name__ == "__main__":
    key = jax.random.PRNGKey(0)
    x = jax.random.normal(key, (2, 4, 16, 16), dtype=jnp.float32)

    mod = Upsample(factor=2, anchor='center')
    y = mod(x)
    jax.block_until_ready(y)
    assert y.shape == (2, 4, 32, 32), y.shape

    # Pure-JAX reference (same separable formulation) to validate the kernel path.
    wh = jnp.asarray(_interp_matrix(16, 32, True))
    ww = jnp.asarray(_interp_matrix(16, 32, True))
    y_ref = jnp.einsum('oh,bchw,pw->bcop', wh, x, ww)
    assert jnp.allclose(y, y_ref, atol=1e-5, rtol=1e-5)

    # Explicit-shape branch (forward(image, shape=...)).
    y2 = mod(x, shape=(24, 24))
    jax.block_until_ready(y2)
    assert y2.shape == (2, 4, 24, 24), y2.shape
    wh24 = jnp.asarray(_interp_matrix(16, 24, True))
    ww24 = jnp.asarray(_interp_matrix(16, 24, True))
    y2_ref = jnp.einsum('oh,bchw,pw->bcop', wh24, x, ww24)
    assert jnp.allclose(y2, y2_ref, atol=1e-5, rtol=1e-5)

    # 'edge' anchor path (align_corners=False).
    y3 = Upsample(factor=2, anchor='edge')(x)
    jax.block_until_ready(y3)
    assert y3.shape == (2, 4, 32, 32), y3.shape

    print("KERNEL_OK")
</pallas_src>

<mosaic_0001>
module attributes {stable_mosaic.version = 11 : i64} {
  func.func @_upsample_kernel_fused(%arg0: i32, %arg1: memref<16x32xf32, #tpu.memory_space<vmem>>, %arg2: memref<16x32xf32, #tpu.memory_space<vmem>>, %arg3: memref<8x16x16xf32, #tpu.memory_space<vmem>>, %arg4: memref<8x32x32xf32, #tpu.memory_space<vmem>>) attributes {dimension_semantics = [#tpu.dimension_semantics<parallel>], iteration_bounds = array<i64: 1>, scalar_prefetch = 0 : i64, scratch_operands = 0 : i64, tpu.core_type = #tpu.core_type<tc>, window_params = [{pipeline_mode = #tpu.pipeline_mode<synchronous>, transform_indices = @transform_0, window_bounds = array<i64: 16, 32>}, {pipeline_mode = #tpu.pipeline_mode<synchronous>, transform_indices = @transform_1, window_bounds = array<i64: 16, 32>}, {transform_indices = @transform_2, window_bounds = array<i64: 8, 16, 16>}, {transform_indices = @transform_3, window_bounds = array<i64: 8, 32, 32>}]} {
    %c0 = arith.constant 0 : index
    %c0_0 = arith.constant 0 : index
    %c0_1 = arith.constant 0 : index
    %0 = vector.load %arg3[%c0, %c0_0, %c0_1] : memref<8x16x16xf32, #tpu.memory_space<vmem>>, vector<8x16x16xf32>
    %1 = tpu.transpose %0, [0, 2, 1] : vector<8x16x16xf32> -> vector<8x16x16xf32>
    %2 = vector.shape_cast %1 : vector<8x16x16xf32> to vector<128x16xf32>
    %c0_2 = arith.constant 0 : index
    %c0_3 = arith.constant 0 : index
    %3 = vector.load %arg1[%c0_2, %c0_3] : memref<16x32xf32, #tpu.memory_space<vmem>>, vector<16x32xf32>
    %cst = arith.constant dense<0.000000e+00> : vector<128x32xf32>
    %4 = tpu.matmul %2, %3, %cst {dimension_numbers = #tpu.dot_dimension_numbers<[1], [0], [0], [1], [0, 0, 1, 1], [], []>} : vector<128x16xf32>, vector<16x32xf32>, vector<128x32xf32> -> vector<128x32xf32>
    %5 = vector.shape_cast %4 : vector<128x32xf32> to vector<8x16x32xf32>
    %6 = tpu.transpose %5, [0, 2, 1] : vector<8x16x32xf32> -> vector<8x32x16xf32>
    %7 = vector.shape_cast %6 : vector<8x32x16xf32> to vector<256x16xf32>
    %c0_4 = arith.constant 0 : index
    %c0_5 = arith.constant 0 : index
    %8 = vector.load %arg2[%c0_4, %c0_5] : memref<16x32xf32, #tpu.memory_space<vmem>>, vector<16x32xf32>
    %cst_6 = arith.constant dense<0.000000e+00> : vector<256x32xf32>
    %9 = tpu.matmul %7, %8, %cst_6 {dimension_numbers = #tpu.dot_dimension_numbers<[1], [0], [0], [1], [0, 0, 1, 1], [], []>} : vector<256x16xf32>, vector<16x32xf32>, vector<256x32xf32> -> vector<256x32xf32>
    %10 = vector.shape_cast %9 : vector<256x32xf32> to vector<8x32x32xf32>
    %c0_7 = arith.constant 0 : index
    %c0_8 = arith.constant 0 : index
    %c0_9 = arith.constant 0 : index
    %11 = vector.load %arg4[%c0_7, %c0_8, %c0_9] : memref<8x32x32xf32, #tpu.memory_space<vmem>>, vector<8x32x32xf32>
    tpu.vector_store %arg4[%c0_7, %c0_8, %c0_9], %10 {strides = array<i32>} : memref<8x32x32xf32, #tpu.memory_space<vmem>>, vector<8x32x32xf32>,
    return
  }
  func.func @transform_0(%arg0: i32) -> (i32, i32) {
    %c0_i32 = arith.constant 0 : i32
    %c0_i32_0 = arith.constant 0 : i32
    %c0_i32_1 = arith.constant 0 : i32
    return %c0_i32, %c0_i32_0 : i32, i32
  }
  func.func @transform_1(%arg0: i32) -> (i32, i32) {
    %c0_i32 = arith.constant 0 : i32
    %c0_i32_0 = arith.constant 0 : i32
    %c0_i32_1 = arith.constant 0 : i32
    return %c0_i32, %c0_i32_0 : i32, i32
  }
  func.func @transform_2(%arg0: i32) -> (i32, i32, i32) {
    %c0_i32 = arith.constant 0 : i32
    %c0_i32_0 = arith.constant 0 : i32
    %c0_i32_1 = arith.constant 0 : i32
    return %arg0, %c0_i32, %c0_i32_0 : i32, i32, i32
  }
  func.func @transform_3(%arg0: i32) -> (i32, i32, i32) {
    %c0_i32 = arith.constant 0 : i32
    %c0_i32_0 = arith.constant 0 : i32
    %c0_i32_1 = arith.constant 0 : i32
    return %arg0, %c0_i32, %c0_i32_0 : i32, i32, i32
  }
}

module attributes {stable_mosaic.version = 11 : i64} {
  func.func @_upsample_kernel_fused(%arg0: i32, %arg1: memref<16x32xf32, #tpu.memory_space<vmem>>, %arg2: memref<16x32xf32, #tpu.memory_space<vmem>>, %arg3: memref<8x16x16xf32, #tpu.memory_space<vmem>>, %arg4: memref<8x32x32xf32, #tpu.memory_space<vmem>>) attributes {dimension_semantics = [#tpu.dimension_semantics<parallel>], iteration_bounds = array<i64: 1>, scalar_prefetch = 0 : i64, scratch_operands = 0 : i64, tpu.core_type = #tpu.core_type<tc>, window_params = [{pipeline_mode = #tpu.pipeline_mode<synchronous>, transform_indices = @transform_0, window_bounds = array<i64: 16, 32>}, {pipeline_mode = #tpu.pipeline_mode<synchronous>, transform_indices = @transform_1, window_bounds = array<i64: 16, 32>}, {transform_indices = @transform_2, window_bounds = array<i64: 8, 16, 16>}, {transform_indices = @transform_3, window_bounds = array<i64: 8, 32, 32>}]} {
    %c0 = arith.constant 0 : index
    %c0_0 = arith.constant 0 : index
    %c0_1 = arith.constant 0 : index
    %0 = vector.load %arg3[%c0, %c0_0, %c0_1] : memref<8x16x16xf32, #tpu.memory_space<vmem>>, vector<8x16x16xf32>
    %1 = tpu.transpose %0, [0, 2, 1] : vector<8x16x16xf32> -> vector<8x16x16xf32>
    %2 = vector.shape_cast %1 : vector<8x16x16xf32> to vector<128x16xf32>
    %c0_2 = arith.constant 0 : index
    %c0_3 = arith.constant 0 : index
    %3 = vector.load %arg1[%c0_2, %c0_3] : memref<16x32xf32, #tpu.memory_space<vmem>>, vector<16x32xf32>
    %cst = arith.constant dense<0.000000e+00> : vector<128x32xf32>
    %4 = tpu.matmul %2, %3, %cst {dimension_numbers = #tpu.dot_dimension_numbers<[1], [0], [0], [1], [0, 0, 1, 1], [], []>} : vector<128x16xf32>, vector<16x32xf32>, vector<128x32xf32> -> vector<128x32xf32>
    %5 = vector.shape_cast %4 : vector<128x32xf32> to vector<8x16x32xf32>
    %6 = tpu.transpose %5, [0, 2, 1] : vector<8x16x32xf32> -> vector<8x32x16xf32>
    %7 = vector.shape_cast %6 : vector<8x32x16xf32> to vector<256x16xf32>
    %c0_4 = arith.constant 0 : index
    %c0_5 = arith.constant 0 : index
    %8 = vector.load %arg2[%c0_4, %c0_5] : memref<16x32xf32, #tpu.memory_space<vmem>>, vector<16x32xf32>
    %cst_6 = arith.constant dense<0.000000e+00> : vector<256x32xf32>
    %9 = tpu.matmul %7, %8, %cst_6 {dimension_numbers = #tpu.dot_dimension_numbers<[1], [0], [0], [1], [0, 0, 1, 1], [], []>} : vector<256x16xf32>, vector<16x32xf32>, vector<256x32xf32> -> vector<256x32xf32>
    %10 = vector.shape_cast %9 : vector<256x32xf32> to vector<8x32x32xf32>
    %c0_7 = arith.constant 0 : index
    %c0_8 = arith.constant 0 : index
    %c0_9 = arith.constant 0 : index
    %11 = vector.load %arg4[%c0_7, %c0_8, %c0_9] : memref<8x32x32xf32, #tpu.memory_space<vmem>>, vector<8x32x32xf32>
    tpu.vector_store %arg4[%c0_7, %c0_8, %c0_9], %10 {strides = array<i32>} : memref<8x32x32xf32, #tpu.memory_space<vmem>>, vector<8x32x32xf32>,
    return
  }
  func.func @transform_0(%arg0: i32) -> (i32, i32) {
    %c0_i32 = arith.constant 0 : i32
    %c0_i32_0 = arith.constant 0 : i32
    %c0_i32_1 = arith.constant 0 : i32
    return %c0_i32, %c0_i32_0 : i32, i32
  }
  func.func @transform_1(%arg0: i32) -> (i32, i32) {
    %c0_i32 = arith.constant 0 : i32
    %c0_i32_0 = arith.constant 0 : i32
    %c0_i32_1 = arith.constant 0 : i32
    return %c0_i32, %c0_i32_0 : i32, i32
  }
  func.func @transform_2(%arg0: i32) -> (i32, i32, i32) {
    %c0_i32 = arith.constant 0 : i32
    %c0_i32_0 = arith.constant 0 : i32
    %c0_i32_1 = arith.constant 0 : i32
    return %arg0, %c0_i32, %c0_i32_0 : i32, i32, i32
  }
  func.func @transform_3(%arg0: i32) -> (i32, i32, i32) {
    %c0_i32 = arith.constant 0 : i32
    %c0_i32_0 = arith.constant 0 : i32
    %c0_i32_1 = arith.constant 0 : i32
    return %arg0, %c0_i32, %c0_i32_0 : i32, i32, i32
  }
}

module attributes {stable_mosaic.version = 11 : i64} {
  func.func @_upsample_kernel_loop(%arg0: i32, %arg1: memref<16x32xf32, #tpu.memory_space<vmem>>, %arg2: memref<16x32xf32, #tpu.memory_space<vmem>>, %arg3: memref<8x16x16xf32, #tpu.memory_space<vmem>>, %arg4: memref<8x32x32xf32, #tpu.memory_space<vmem>>) attributes {dimension_semantics = [#tpu.dimension_semantics<parallel>], iteration_bounds = array<i64: 1>, scalar_prefetch = 0 : i64, scratch_operands = 0 : i64, tpu.core_type = #tpu.core_type<tc>, window_params = [{pipeline_mode = #tpu.pipeline_mode<synchronous>, transform_indices = @transform_0, window_bounds = array<i64: 16, 32>}, {pipeline_mode = #tpu.pipeline_mode<synchronous>, transform_indices = @transform_1, window_bounds = array<i64: 16, 32>}, {transform_indices = @transform_2, window_bounds = array<i64: 8, 16, 16>}, {transform_indices = @transform_3, window_bounds = array<i64: 8, 32, 32>}]} {
    %c0 = arith.constant 0 : index
    %c0_0 = arith.constant 0 : index
    %c0_1 = arith.constant 0 : index
    %0 = vector.load %arg3[%c0, %c0_0, %c0_1] : memref<8x16x16xf32, #tpu.memory_space<vmem>>, vector<8x16x16xf32>
    %1 = vector.shape_cast %0 : vector<8x16x16xf32> to vector<128x16xf32>
    %c0_2 = arith.constant 0 : index
    %c0_3 = arith.constant 0 : index
    %2 = vector.load %arg2[%c0_2, %c0_3] : memref<16x32xf32, #tpu.memory_space<vmem>>, vector<16x32xf32>
    %cst = arith.constant dense<0.000000e+00> : vector<128x32xf32>
    %3 = tpu.matmul %1, %2, %cst {dimension_numbers = #tpu.dot_dimension_numbers<[1], [0], [0], [1], [0, 0, 1, 1], [], []>} : vector<128x16xf32>, vector<16x32xf32>, vector<128x32xf32> -> vector<128x32xf32>
    %4 = vector.shape_cast %3 : vector<128x32xf32> to vector<8x16x32xf32>
    %c0_4 = arith.constant 0 : index
    %c0_5 = arith.constant 0 : index
    %5 = vector.load %arg1[%c0_4, %c0_5] : memref<16x32xf32, #tpu.memory_space<vmem>>, vector<16x32xf32>
    %6 = tpu.transpose %5, [1, 0] : vector<16x32xf32> -> vector<32x16xf32>
    %7 = vector.extract_strided_slice %4 {offsets = [0, 0, 0], sizes = [1, 16, 32], strides = [1, 1, 1]} : vector<8x16x32xf32> to vector<1x16x32xf32>
    %8 = vector.shape_cast %7 : vector<1x16x32xf32> to vector<16x32xf32>
    %cst_6 = arith.constant dense<0.000000e+00> : vector<32x32xf32>
    %9 = tpu.matmul %6, %8, %cst_6 {dimension_numbers = #tpu.dot_dimension_numbers<[1], [0], [0], [1], [0, 0, 1, 1], [], []>} : vector<32x16xf32>, vector<16x32xf32>, vector<32x32xf32> -> vector<32x32xf32>
    %c0_7 = arith.constant 0 : index
    %c0_8 = arith.constant 0 : index
    %c0_9 = arith.constant 0 : index
    %10 = vector.load %arg4[%c0_7, %c0_8, %c0_9] : memref<8x32x32xf32, #tpu.memory_space<vmem>>, vector<1x32x32xf32>
    %11 = vector.shape_cast %10 : vector<1x32x32xf32> to vector<32x32xf32>
    %12 = vector.shape_cast %9 : vector<32x32xf32> to vector<1x32x32xf32>
    tpu.vector_store %arg4[%c0_7, %c0_8, %c0_9], %12 {strides = array<i32>} : memref<8x32x32xf32, #tpu.memory_space<vmem>>, vector<1x32x32xf32>,
    %13 = vector.extract_strided_slice %4 {offsets = [1, 0, 0], sizes = [1, 16, 32], strides = [1, 1, 1]} : vector<8x16x32xf32> to vector<1x16x32xf32>
    %14 = vector.shape_cast %13 : vector<1x16x32xf32> to vector<16x32xf32>
    %cst_10 = arith.constant dense<0.000000e+00> : vector<32x32xf32>
    %15 = tpu.matmul %6, %14, %cst_10 {dimension_numbers = #tpu.dot_dimension_numbers<[1], [0], [0], [1], [0, 0, 1, 1], [], []>} : vector<32x16xf32>, vector<16x32xf32>, vector<32x32xf32> -> vector<32x32xf32>
    %c1 = arith.constant 1 : index
    %c0_11 = arith.constant 0 : index
    %c0_12 = arith.constant 0 : index
    %16 = vector.load %arg4[%c1, %c0_11, %c0_12] : memref<8x32x32xf32, #tpu.memory_space<vmem>>, vector<1x32x32xf32>
    %17 = vector.shape_cast %16 : vector<1x32x32xf32> to vector<32x32xf32>
    %18 = vector.shape_cast %15 : vector<32x32xf32> to vector<1x32x32xf32>
    tpu.vector_store %arg4[%c1, %c0_11, %c0_12], %18 {strides = array<i32>} : memref<8x32x32xf32, #tpu.memory_space<vmem>>, vector<1x32x32xf32>,
    %19 = vector.extract_strided_slice %4 {offsets = [2, 0, 0], sizes = [1, 16, 32], strides = [1, 1, 1]} : vector<8x16x32xf32> to vector<1x16x32xf32>
    %20 = vector.shape_cast %19 : vector<1x16x32xf32> to vector<16x32xf32>
    %cst_13 = arith.constant dense<0.000000e+00> : vector<32x32xf32>
    %21 = tpu.matmul %6, %20, %cst_13 {dimension_numbers = #tpu.dot_dimension_numbers<[1], [0], [0], [1], [0, 0, 1, 1], [], []>} : vector<32x16xf32>, vector<16x32xf32>, vector<32x32xf32> -> vector<32x32xf32>
    %c2 = arith.constant 2 : index
    %c0_14 = arith.constant 0 : index
    %c0_15 = arith.constant 0 : index
    %22 = vector.load %arg4[%c2, %c0_14, %c0_15] : memref<8x32x32xf32, #tpu.memory_space<vmem>>, vector<1x32x32xf32>
    %23 = vector.shape_cast %22 : vector<1x32x32xf32> to vector<32x32xf32>
    %24 = vector.shape_cast %21 : vector<32x32xf32> to vector<1x32x32xf32>
    tpu.vector_store %arg4[%c2, %c0_14, %c0_15], %24 {strides = array<i32>} : memref<8x32x32xf32, #tpu.memory_space<vmem>>, vector<1x32x32xf32>,
    %25 = vector.extract_strided_slice %4 {offsets = [3, 0, 0], sizes = [1, 16, 32], strides = [1, 1, 1]} : vector<8x16x32xf32> to vector<1x16x32xf32>
    %26 = vector.shape_cast %25 : vector<1x16x32xf32> to vector<16x32xf32>
    %cst_16 = arith.constant dense<0.000000e+00> : vector<32x32xf32>
    %27 = tpu.matmul %6, %26, %cst_16 {dimension_numbers = #tpu.dot_dimension_numbers<[1], [0], [0], [1], [0, 0, 1, 1], [], []>} : vector<32x16xf32>, vector<16x32xf32>, vector<32x32xf32> -> vector<32x32xf32>
    %c3 = arith.constant 3 : index
    %c0_17 = arith.constant 0 : index
    %c0_18 = arith.constant 0 : index
    %28 = vector.load %arg4[%c3, %c0_17, %c0_18] : memref<8x32x32xf32, #tpu.memory_space<vmem>>, vector<1x32x32xf32>
    %29 = vector.shape_cast %28 : vector<1x32x32xf32> to vector<32x32xf32>
    %30 = vector.shape_cast %27 : vector<32x32xf32> to vector<1x32x32xf32>
    tpu.vector_store %arg4[%c3, %c0_17, %c0_18], %30 {strides = array<i32>} : memref<8x32x32xf32, #tpu.memory_space<vmem>>, vector<1x32x32xf32>,
    %31 = vector.extract_strided_slice %4 {offsets = [4, 0, 0], sizes = [1, 16, 32], strides = [1, 1, 1]} : vector<8x16x32xf32> to vector<1x16x32xf32>
    %32 = vector.shape_cast %31 : vector<1x16x32xf32> to vector<16x32xf32>
    %cst_19 = arith.constant dense<0.000000e+00> : vector<32x32xf32>
    %33 = tpu.matmul %6, %32, %cst_19 {dimension_numbers = #tpu.dot_dimension_numbers<[1], [0], [0], [1], [0, 0, 1, 1], [], []>} : vector<32x16xf32>, vector<16x32xf32>, vector<32x32xf32> -> vector<32x32xf32>
    %c4 = arith.constant 4 : index
    %c0_20 = arith.constant 0 : index
    %c0_21 = arith.constant 0 : index
    %34 = vector.load %arg4[%c4, %c0_20, %c0_21] : memref<8x32x32xf32, #tpu.memory_space<vmem>>, vector<1x32x32xf32>
    %35 = vector.shape_cast %34 : vector<1x32x32xf32> to vector<32x32xf32>
    %36 = vector.shape_cast %33 : vector<32x32xf32> to vector<1x32x32xf32>
    tpu.vector_store %arg4[%c4, %c0_20, %c0_21], %36 {strides = array<i32>} : memref<8x32x32xf32, #tpu.memory_space<vmem>>, vector<1x32x32xf32>,
    %37 = vector.extract_strided_slice %4 {offsets = [5, 0, 0], sizes = [1, 16, 32], strides = [1, 1, 1]} : vector<8x16x32xf32> to vector<1x16x32xf32>
    %38 = vector.shape_cast %37 : vector<1x16x32xf32> to vector<16x32xf32>
    %cst_22 = arith.constant dense<0.000000e+00> : vector<32x32xf32>
    %39 = tpu.matmul %6, %38, %cst_22 {dimension_numbers = #tpu.dot_dimension_numbers<[1], [0], [0], [1], [0, 0, 1, 1], [], []>} : vector<32x16xf32>, vector<16x32xf32>, vector<32x32xf32> -> vector<32x32xf32>
    %c5 = arith.constant 5 : index
    %c0_23 = arith.constant 0 : index
    %c0_24 = arith.constant 0 : index
    %40 = vector.load %arg4[%c5, %c0_23, %c0_24] : memref<8x32x32xf32, #tpu.memory_space<vmem>>, vector<1x32x32xf32>
    %41 = vector.shape_cast %40 : vector<1x32x32xf32> to vector<32x32xf32>
    %42 = vector.shape_cast %39 : vector<32x32xf32> to vector<1x32x32xf32>
    tpu.vector_store %arg4[%c5, %c0_23, %c0_24], %42 {strides = array<i32>} : memref<8x32x32xf32, #tpu.memory_space<vmem>>, vector<1x32x32xf32>,
    %43 = vector.extract_strided_slice %4 {offsets = [6, 0, 0], sizes = [1, 16, 32], strides = [1, 1, 1]} : vector<8x16x32xf32> to vector<1x16x32xf32>
    %44 = vector.shape_cast %43 : vector<1x16x32xf32> to vector<16x32xf32>
    %cst_25 = arith.constant dense<0.000000e+00> : vector<32x32xf32>
    %45 = tpu.matmul %6, %44, %cst_25 {dimension_numbers = #tpu.dot_dimension_numbers<[1], [0], [0], [1], [0, 0, 1, 1], [], []>} : vector<32x16xf32>, vector<16x32xf32>, vector<32x32xf32> -> vector<32x32xf32>
    %c6 = arith.constant 6 : index
    %c0_26 = arith.constant 0 : index
    %c0_27 = arith.constant 0 : index
    %46 = vector.load %arg4[%c6, %c0_26, %c0_27] : memref<8x32x32xf32, #tpu.memory_space<vmem>>, vector<1x32x32xf32>
    %47 = vector.shape_cast %46 : vector<1x32x32xf32> to vector<32x32xf32>
    %48 = vector.shape_cast %45 : vector<32x32xf32> to vector<1x32x32xf32>
    tpu.vector_store %arg4[%c6, %c0_26, %c0_27], %48 {strides = array<i32>} : memref<8x32x32xf32, #tpu.memory_space<vmem>>, vector<1x32x32xf32>,
    %49 = vector.extract_strided_slice %4 {offsets = [7, 0, 0], sizes = [1, 16, 32], strides = [1, 1, 1]} : vector<8x16x32xf32> to vector<1x16x32xf32>
    %50 = vector.shape_cast %49 : vector<1x16x32xf32> to vector<16x32xf32>
    %cst_28 = arith.constant dense<0.000000e+00> : vector<32x32xf32>
    %51 = tpu.matmul %6, %50, %cst_28 {dimension_numbers = #tpu.dot_dimension_numbers<[1], [0], [0], [1], [0, 0, 1, 1], [], []>} : vector<32x16xf32>, vector<16x32xf32>, vector<32x32xf32> -> vector<32x32xf32>
    %c7 = arith.constant 7 : index
    %c0_29 = arith.constant 0 : index
    %c0_30 = arith.constant 0 : index
    %52 = vector.load %arg4[%c7, %c0_29, %c0_30] : memref<8x32x32xf32, #tpu.memory_space<vmem>>, vector<1x32x32xf32>
    %53 = vector.shape_cast %52 : vector<1x32x32xf32> to vector<32x32xf32>
    %54 = vector.shape_cast %51 : vector<32x32xf32> to vector<1x32x32xf32>
    tpu.vector_store %arg4[%c7, %c0_29, %c0_30], %54 {strides = array<i32>} : memref<8x32x32xf32, #tpu.memory_space<vmem>>, vector<1x32x32xf32>,
    return
  }
  func.func @transform_0(%arg0: i32) -> (i32, i32) {
    %c0_i32 = arith.constant 0 : i32
    %c0_i32_0 = arith.constant 0 : i32
    %c0_i32_1 = arith.constant 0 : i32
    return %c0_i32, %c0_i32_0 : i32, i32
  }
  func.func @transform_1(%arg0: i32) -> (i32, i32) {
    %c0_i32 = arith.constant 0 : i32
    %c0_i32_0 = arith.constant 0 : i32
    %c0_i32_1 = arith.constant 0 : i32
    return %c0_i32, %c0_i32_0 : i32, i32
  }
  func.func @transform_2(%arg0: i32) -> (i32, i32, i32) {
    %c0_i32 = arith.constant 0 : i32
    %c0_i32_0 = arith.constant 0 : i32
    %c0_i32_1 = arith.constant 0 : i32
    return %arg0, %c0_i32, %c0_i32_0 : i32, i32, i32
  }
  func.func @transform_3(%arg0: i32) -> (i32, i32, i32) {
    %c0_i32 = arith.constant 0 : i32
    %c0_i32_0 = arith.constant 0 : i32
    %c0_i32_1 = arith.constant 0 : i32
    return %arg0, %c0_i32, %c0_i32_0 : i32, i32, i32
  }
}

</mosaic_0001>

<bundles_post_ra>
// kernel: tpu_custom_call.1
= control target key start
LH: loop header
LB: loop body
LE: loop exit
PB: predicated region body
PF: predicated region fallthrough
CT: control target
= control target key end

     0   :  { %8 = vsyncpa [#allocation3], 0  ;;  %s1618_s0 = inlined_call_operand.hbm [shape: f32[16,32], index: 0, kind: input, shape index: {}]   ;;  %s1619_s1 = inlined_call_operand.hbm [shape: f32[16,32], index: 1, kind: input, shape index: {}]   ;;  %s1620_s2 = inlined_call_operand.hbm [shape: f32[8,16,16], index: 2, kind: input, shape index: {}]   ;;  %s1621_s3 = inlined_call_operand.hbm [shape: f32[8,32,32], index: 3, kind: output, shape index: {}]  }
   0x1   :  { %9 = vsyncpa [#allocation6], 0 }
   0x2   :  { %10 = vsyncpa [#allocation4], 0  ;;  %s1445_s12 = smov [#allocation5]   ;;  %s1446_s14 = smov [#allocation2]  }
   0x3   :  { %s28_s13 = sshll.u32 %s1445_s12, 4  ;;  %s16_s15 = sshll.u32 %s1446_s14, 4  ;;  %s29_s13 = int_to_ptr.vmem [resolvable:$true] %s28_s13  ;;  %s1471_s15 = int_to_ptr.vmem [resolvable:$true] %s16_s15 }
   0x4   :  { %s1351_s18 = scalar_lea.hbm %s1619_s1, 256 }
   0x5   :  { %p1352_p0 = scmp.ne.s32.totalorder %s1619_s1, %s1351_s18  ;;  %p1355_p1 = scmp.lt.u32.totalorder %s1351_s18, %s1619_s1 }
   0x7   :  { %p1357_p2 = pnand %p1355_p1, %p1352_p0 }
   0x9   :  { %1360 = shalt.err (!%p1357_p2)
}
   0xa   :  { %s1361_s23 = scalar_lea.vmem %s29_s13, 256  ;;  %p1366_p4 = scmp.lt.s32.totalorder %s29_s13, %s29_s13 }
   0xb   :  { %p1362_p3 = scmp.ne.s32.totalorder %s29_s13, %s1361_s23  ;;  %p1367_p5 = scmp.lt.s32.totalorder %s1361_s23, %s1361_s23 }
   0xd   :  { %p1368_p6 = por %p1367_p5, %p1366_p4 }
   0xf   :  { %p1369_p7 = pnand %p1368_p6, %p1362_p3 }
  0x11   :  { %1372 = shalt.err (!%p1369_p7)
}
  0x12   :  { %s1447_s24 = smov 128   ;;  %s1448_s25 = smov 8  }
  0x13   :  { %34 = dma.hbm_to_vmem [thread:$0]  %s1619_s1, 256, %s29_s13, [#allocation6], %s1447_s24, %s1447_s24, %s1448_s25  }
  0x14   :  { %s1373_s30 = scalar_lea.hbm %s1618_s0, 256 }
  0x15   :  { %p1374_p8 = scmp.ne.s32.totalorder %s1618_s0, %s1373_s30  ;;  %p1377_p9 = scmp.lt.u32.totalorder %s1373_s30, %s1618_s0 }
  0x17   :  { %p1379_p10 = pnand %p1377_p9, %p1374_p8 }
  0x19   :  { %1382 = shalt.err (!%p1379_p10)
}
  0x1a   :  { %s1383_s8 = scalar_lea.vmem %s1471_s15, 256  ;;  %p1388_p12 = scmp.lt.s32.totalorder %s1471_s15, %s1471_s15 }
  0x1b   :  { %p1384_p11 = scmp.ne.s32.totalorder %s1471_s15, %s1383_s8  ;;  %p1389_p13 = scmp.lt.s32.totalorder %s1383_s8, %s1383_s8 }
  0x1d   :  { %p1390_p0 = por %p1389_p13, %p1388_p12 }
  0x1f   :  { %p1391_p1 = pnand %p1390_p0, %p1384_p11 }
  0x21   :  { %1394 = shalt.err (!%p1391_p1)
}
  0x22   :  { %22 = dma.hbm_to_vmem [thread:$0]  %s1618_s0, 256, %s1471_s15, [#allocation3], %s1447_s24, %s1447_s24, %s1448_s25  }
  0x23   :  { %s1449_s10 = smov [#allocation7]   ;;  %s1395_s14 = scalar_lea.hbm %s1620_s2, 2048 }
  0x24   :  { %s40_s11 = sshll.u32 %s1449_s10, 4  ;;  %p1396_p2 = scmp.ne.s32.totalorder %s1620_s2, %s1395_s14  ;;  %s41_s11 = int_to_ptr.vmem [resolvable:$true] %s40_s11 }
  0x25   :  { %p1399_p3 = scmp.lt.u32.totalorder %s1395_s14, %s1620_s2 }
  0x27   :  { %p1401_p4 = pnand %p1399_p3, %p1396_p2 }
  0x29   :  { %1404 = shalt.err (!%p1401_p4)
}
  0x2a   :  { %s1405_s20 = scalar_lea.vmem %s41_s11, 2048  ;;  %p1410_p6 = scmp.lt.s32.totalorder %s41_s11, %s41_s11 }
  0x2b   :  { %p1406_p5 = scmp.ne.s32.totalorder %s41_s11, %s1405_s20  ;;  %p1411_p7 = scmp.lt.s32.totalorder %s1405_s20, %s1405_s20 }
  0x2d   :  { %p1412_p8 = por %p1411_p7, %p1410_p6 }
  0x2f   :  { %p1413_p9 = pnand %p1412_p8, %p1406_p5 }
  0x31   :  { %1416 = shalt.err (!%p1413_p9)
}
  0x32   :  { %46 = dma.hbm_to_vmem [thread:$0]  %s1620_s2, 2048, %s41_s11, [#allocation6], %s1447_s24, %s1447_s24, %s1448_s25  }
  0x33   :  { %1439 = dma.done.wait [#allocation3], 256  }
  0x34   :  { %1440 = vsyncadd [#allocation3], 4294967040 }
  0x35   :  { %1441 = dma.done.wait [#allocation6], 2304  }
  0x36   :  { %1442 = vsyncadd [#allocation6], 4294964992  ;;  %v56_v0 = vld [vmem:[#allocation7] sm:$0xff]  ;;  %v58_v1 = vld [vmem:[#allocation7 + $0x10] sm:$0xff]  ;;  %vm330_vm0 = vcmask 130048   ;;  %vm1103_vm1 = vcmask 261120  }
  0x37   :  { %72 = vxpose.xlu0.b32.start [1/2] (short) (narrow) %v56_v0, 16  ;;  %104 = vxpose.xlu1.b32.start [1/2] (short) (narrow) %v58_v1, 16  ;;  %v57_v2 = vld [vmem:[#allocation7 + $0x8] sm:$0xff]  ;;  %v59_v3 = vld [vmem:[#allocation7 + $0x18] sm:$0xff]  ;;  %v328_v4 = vld [vmem:[#allocation2] sm:$0xff]  ;;  %s1450_s2 = smov [#allocation8]  }
  0x38   :  { %v329_v5 = vld [vmem:[#allocation2 + $0x8] sm:$0xff]  ;;  %v60_v6 = vld [vmem:[#allocation7 + $0x20] sm:$0xff]  ;;  %v62_v7 = vld [vmem:[#allocation7 + $0x30] sm:$0xff]  ;;  %s1141_s21 = sshll.u32 %s1450_s2, 4  ;;  %s1142_s21 = int_to_ptr.vmem [resolvable:$true] %s1141_s21 }
  0x39   :  { %v1334_v8 = vpack.c.bf16 %v329_v5, %v328_v4  ;;  %v61_v9 = vld [vmem:[#allocation7 + $0x28] sm:$0xff]  ;;  %v63_v10 = vld [vmem:[#allocation7 + $0x38] sm:$0xff]  ;;  %v64_v11 = vld [vmem:[#allocation7 + $0x40] sm:$0xff]  ;;  %s1417_s22 = scalar_lea.vmem %s1142_s21, 4096  ;;  %p1422_p11 = scmp.lt.s32.totalorder %s1142_s21, %s1142_s21 }
  0x3a   :  { %v66_v12 = vld [vmem:[#allocation7 + $0x50] sm:$0xff]  ;;  %v65_v13 = vld [vmem:[#allocation7 + $0x48] sm:$0xff]  ;;  %v67_v14 = vld [vmem:[#allocation7 + $0x58] sm:$0xff]  ;;  %p1418_p10 = scmp.ne.s32.totalorder %s1142_s21, %s1417_s22  ;;  %p1423_p12 = scmp.lt.s32.totalorder %s1417_s22, %s1417_s22 }
  0x3b   :  { %73 = vxpose.xlu0.b32.end [2/2] (short) (narrow) %v57_v2, 16  ;;  %105 = vxpose.xlu1.b32.end [2/2] (short) (narrow) %v59_v3, 16  ;;  %v68_v15 = vld [vmem:[#allocation7 + $0x60] sm:$0xff]  ;;  %v70_v16 = vld [vmem:[#allocation7 + $0x70] sm:$0xff]  ;;  %v69_v17 = vld [vmem:[#allocation7 + $0x68] sm:$0xff] }
  0x3c   :  { %1335 = vmatprep.subr.bf16.mxu0 %v1334_v8  ;;  %v71_v18 = vld [vmem:[#allocation7 + $0x78] sm:$0xff]  ;;  %v780_v41 = vld [vmem:[#allocation5] sm:$0xff]  ;;  %p1424_p13 = por %p1423_p12, %p1422_p11 }
  0x3d   :  { %1337 = vmatpush3.bf16.msra.mxu0 %v1334_v8  ;;  %v781_v42 = vld [vmem:[#allocation5 + $0x8] sm:$0xff] }
  0x3e   :  { %v1338_v43 = vpack.c.bf16 %v781_v42, %v780_v41  ;;  %p1425_p0 = pnand %p1424_p13, %p1418_p10 }
  0x3f   :  { %136 = vxpose.xlu0.b32.start [1/2] (short) (narrow) %v60_v6, 16  ;;  %168 = vxpose.xlu1.b32.start [1/2] (short) (narrow) %v62_v7, 16 }
  0x40   :  { %1342 = vmatprep.subr.bf16.mxu1 %v1338_v43  ;;  %1339 = vmatprep.subr.bf16.mxu0 %v1338_v43 }
  0x41   :  { %1343 = vmatpush3.bf16.msra.mxu1 %v1338_v43 }
  0x43   :  { %137 = vxpose.xlu0.b32.end [2/2] (short) (narrow) %v61_v9, 16  ;;  %169 = vxpose.xlu1.b32.end [2/2] (short) (narrow) %v63_v10, 16 }
  0x47   :  { %200 = vxpose.xlu0.b32.start [1/2] (short) (narrow) %v64_v11, 16  ;;  %232 = vxpose.xlu1.b32.start [1/2] (short) (narrow) %v66_v12, 16 }
  0x4b   :  { %201 = vxpose.xlu0.b32.end [2/2] (short) (narrow) %v65_v13, 16  ;;  %233 = vxpose.xlu1.b32.end [2/2] (short) (narrow) %v67_v14, 16 }
  0x4f   :  { %264 = vxpose.xlu0.b32.start [1/2] (short) (narrow) %v68_v15, 16  ;;  %296 = vxpose.xlu1.b32.start [1/2] (short) (narrow) %v70_v16, 16 }
  0x53   :  { %265 = vxpose.xlu0.b32.end [2/2] (short) (narrow) %v69_v17, 16  ;;  %297 = vxpose.xlu1.b32.end [2/2] (short) (narrow) %v71_v18, 16 }
  0xb7   :  { %v88_v19 = vpop.trf.xlu0  ;;  %v120_v20 = vpop.trf.xlu1 }
  0xb8   :  { %1258 = vmatprep.mubr.msk.f32.mxu0 %vm330_vm0, %v88_v19 }
  0xbb   :  { %v89_v21 = vpop.trf.xlu0  ;;  %v121_v22 = vpop.trf.xlu1 }
  0xbc   :  { %1259 = vmatmul.mubr.msk.f32.vlgmr.msra.gmra.mrb[0].mxu0 %vm330_vm0, %v89_v21 }
  0xbd   :  { %1261 = vmatprep.mubr.msk.f32.mxu0 %vm330_vm0, %v120_v20  ;;  %1341 = vmatpush3.bf16.msra.mxu0 %v1338_v43 }
  0xbf   :  { %v152_v23 = vpop.trf.xlu0  ;;  %v184_v24 = vpop.trf.xlu1 }
  0xc0   :  { %1262 = vmatmul.mubr.msk.f32.gmra.mrb[2].mxu0 %vm330_vm0, %v121_v22 }
  0xc1   :  { %1264 = vmatprep.mubr.msk.f32.mxu0 %vm330_vm0, %v152_v23 }
  0xc3   :  { %v153_v25 = vpop.trf.xlu0  ;;  %v185_v26 = vpop.trf.xlu1 }
  0xc4   :  { %1265 = vmatmul.mubr.msk.f32.gmra.mrb[4].mxu0 %vm330_vm0, %v153_v25 }
  0xc5   :  { %1267 = vmatprep.mubr.msk.f32.mxu0 %vm330_vm0, %v184_v24 }
  0xc7   :  { %v216_v27 = vpop.trf.xlu0  ;;  %v248_v28 = vpop.trf.xlu1 }
  0xc8   :  { %1268 = vmatmul.mubr.msk.f32.gmra.mrb[6].mxu0 %vm330_vm0, %v185_v26 }
  0xc9   :  { %1270 = vmatprep.mubr.msk.f32.mxu0 %vm330_vm0, %v216_v27 }
  0xcb   :  { %v217_v29 = vpop.trf.xlu0  ;;  %v249_v30 = vpop.trf.xlu1 }
  0xcc   :  { %1271 = vmatmul.mubr.msk.f32.gmra.mrb[8].mxu0 %vm330_vm0, %v217_v29 }
  0xcd   :  { %1273 = vmatprep.mubr.msk.f32.mxu0 %vm330_vm0, %v248_v28 }
  0xcf   :  { %v280_v31 = vpop.trf.xlu0  ;;  %v312_v32 = vpop.trf.xlu1 }
  0xd0   :  { %1274 = vmatmul.mubr.msk.f32.gmra.mrb[10].mxu0 %vm330_vm0, %v249_v30 }
  0xd1   :  { %1276 = vmatprep.mubr.msk.f32.mxu0 %vm330_vm0, %v280_v31 }
  0xd3   :  { %v281_v33 = vpop.trf.xlu0  ;;  %v313_v34 = vpop.trf.xlu1 }
  0xd4   :  { %1277 = vmatmul.mubr.msk.f32.gmra.mrb[12].mxu0 %vm330_vm0, %v281_v33 }
  0xd5   :  { %1279 = vmatprep.mubr.msk.f32.mxu0 %vm330_vm0, %v312_v32 }
  0xd8   :  { %1280 = vmatmul.mubr.msk.f32.gmra.mrb[14].mxu0 %vm330_vm0, %v313_v34 }
 0x18f   :  { %v1260_v35 = vpop.f32.mrb[0].mxu0 }
 0x190   :  { %v445_v36 = vpop.f32.mrb[1].mxu0 }
 0x193   :  { %v1263_v37 = vpop.f32.mrb[2].mxu0 }
 0x194   :  { %v455_v38 = vpop.f32.mrb[3].mxu0 }
 0x197   :  { %v1266_v39 = vpop.f32.mrb[4].mxu0 }
 0x198   :  { %v465_v40 = vpop.f32.mrb[5].mxu0 }
 0x199   :  { %588 = vxpose.xlu0.b32.start [1/2] (short) (narrow) %v465_v40, 32 }
 0x19b   :  { %v1269_v44 = vpop.f32.mrb[6].mxu0 }
 0x19c   :  { %v475_v45 = vpop.f32.mrb[7].mxu0 }
 0x19d   :  { %589 = vxpose.xlu0.b32.end [2/2] (short) (narrow) %v1266_v39, 32  ;;  %620 = vxpose.xlu1.b32.start [1/2] (short) (narrow) %v475_v45, 32 }
 0x19f   :  { %v1272_v46 = vpop.f32.mrb[8].mxu0 }
 0x1a0   :  { %v485_v47 = vpop.f32.mrb[9].mxu0 }
 0x1a1   :  { %621 = vxpose.xlu1.b32.end [2/2] (short) (narrow) %v1269_v44, 32 }
 0x1a3   :  { %v1275_v48 = vpop.f32.mrb[10].mxu0 }
 0x1a4   :  { %v495_v49 = vpop.f32.mrb[11].mxu0 }
 0x1a6   :  { %652 = vxpose.xlu0.b32.start [1/2] (short) (narrow) %v485_v47, 32 }
 0x1a7   :  { %v1278_v50 = vpop.f32.mrb[12].mxu0 }
 0x1a8   :  { %v505_v51 = vpop.f32.mrb[13].mxu0 }
 0x1aa   :  { %653 = vxpose.xlu0.b32.end [2/2] (short) (narrow) %v1272_v46, 32  ;;  %684 = vxpose.xlu1.b32.start [1/2] (short) (narrow) %v495_v49, 32 }
 0x1ab   :  { %v1281_v52 = vpop.f32.mrb[14].mxu0 }
 0x1ac   :  { %v515_v53 = vpop.f32.mrb[15].mxu0 }
 0x1ae   :  { %685 = vxpose.xlu1.b32.end [2/2] (short) (narrow) %v1275_v48, 32 }
 0x1b3   :  { %524 = vxpose.xlu0.b32.start [1/2] (short) (narrow) %v445_v36, 32 }
 0x1b7   :  { %525 = vxpose.xlu0.b32.end [2/2] (short) (narrow) %v1260_v35, 32  ;;  %716 = vxpose.xlu1.b32.start [1/2] (short) (narrow) %v505_v51, 32 }
 0x1bb   :  { %717 = vxpose.xlu1.b32.end [2/2] (short) (narrow) %v1278_v50, 32 }
 0x1c0   :  { %556 = vxpose.xlu0.b32.start [1/2] (short) (narrow) %v455_v38, 32 }
 0x1c4   :  { %557 = vxpose.xlu0.b32.end [2/2] (short) (narrow) %v1263_v37, 32  ;;  %748 = vxpose.xlu1.b32.start [1/2] (short) (narrow) %v515_v53, 32 }
 0x1c8   :  { %749 = vxpose.xlu1.b32.end [2/2] (short) (narrow) %v1281_v52, 32 }
 0x219   :  { %v604_v54 = vpop.trf.xlu0 }
 0x21a   :  { %1298 = vmatprep.mubr.msk.f32.mxu1 %vm330_vm0, %v604_v54 }
 0x21d   :  { %v636_v55 = vpop.trf.xlu1  ;;  %v605_v56 = vpop.trf.xlu0 }
 0x21e   :  { %1299 = vmatmul.mubr.msk.f32.vlgmr.msra.gmra.mrb[0].mxu1 %vm330_vm0, %v605_v56 }
 0x221   :  { %v637_v57 = vpop.trf.xlu1  ;;  %v606_v58 = vpop.trf.xlu0 }
 0x222   :  { %1301 = vmatprep.mubr.msk.f32.mxu1 %vm330_vm0, %v606_v58 }
 0x225   :  { %v638_v59 = vpop.trf.xlu1  ;;  %v607_v60 = vpop.trf.xlu0 }
 0x226   :  { %1302 = vmatmul.mubr.msk.f32.gmra.mrb[2].mxu1 %vm330_vm0, %v607_v60 }
 0x227   :  { %1304 = vmatprep.mubr.msk.f32.mxu1 %vm330_vm0, %v636_v55 }
 0x229   :  { %v639_v61 = vpop.trf.xlu1  ;;  %v668_v62 = vpop.trf.xlu0 }
 0x22a   :  { %1305 = vmatmul.mubr.msk.f32.gmra.mrb[4].mxu1 %vm330_vm0, %v637_v57 }
 0x22b   :  { %1307 = vmatprep.mubr.msk.f32.mxu1 %vm330_vm0, %v638_v59 }
 0x22d   :  { %v700_v63 = vpop.trf.xlu1  ;;  %v669_v0 = vpop.trf.xlu0 }
 0x22e   :  { %1308 = vmatmul.mubr.msk.f32.gmra.mrb[6].mxu1 %vm330_vm0, %v639_v61 }
 0x22f   :  { %1310 = vmatprep.mubr.msk.f32.mxu1 %vm330_vm0, %v668_v62 }
 0x231   :  { %v701_v1 = vpop.trf.xlu1  ;;  %v670_v2 = vpop.trf.xlu0 }
 0x232   :  { %1311 = vmatmul.mubr.msk.f32.gmra.mrb[8].mxu1 %vm330_vm0, %v669_v0 }
 0x233   :  { %1313 = vmatprep.mubr.msk.f32.mxu1 %vm330_vm0, %v670_v2 }
 0x235   :  { %v702_v3 = vpop.trf.xlu1  ;;  %v671_v4 = vpop.trf.xlu0 }
 0x236   :  { %1314 = vmatmul.mubr.msk.f32.gmra.mrb[10].mxu1 %vm330_vm0, %v671_v4 }
 0x237   :  { %1316 = vmatprep.mubr.msk.f32.mxu1 %vm330_vm0, %v700_v63 }
 0x239   :  { %v703_v5 = vpop.trf.xlu1  ;;  %v540_v6 = vpop.trf.xlu0 }
 0x23a   :  { %1317 = vmatmul.mubr.msk.f32.gmra.mrb[12].mxu1 %vm330_vm0, %v701_v1  ;;  %1286 = vmatprep.mubr.msk.f32.mxu0 %vm330_vm0, %v540_v6 }
 0x23b   :  { %1319 = vmatprep.mubr.msk.f32.mxu1 %vm330_vm0, %v702_v3 }
 0x23d   :  { %v732_v7 = vpop.trf.xlu1  ;;  %v541_v8 = vpop.trf.xlu0 }
 0x23e   :  { %1320 = vmatmul.mubr.msk.f32.gmra.mrb[14].mxu1 %vm330_vm0, %v703_v5  ;;  %1287 = vmatmul.mubr.msk.f32.vlgmr.msra.gmra.mrb[16].mxu0 %vm330_vm0, %v541_v8 }
 0x23f   :  { %1322 = vmatprep.mubr.msk.f32.mxu1 %vm330_vm0, %v732_v7 }
 0x241   :  { %v733_v9 = vpop.trf.xlu1  ;;  %v542_v10 = vpop.trf.xlu0 }
 0x242   :  { %1323 = vmatmul.mubr.msk.f32.gmra.mrb[16].mxu1 %vm330_vm0, %v733_v9  ;;  %1289 = vmatprep.mubr.msk.f32.mxu0 %vm330_vm0, %v542_v10 }
 0x245   :  { %v734_v11 = vpop.trf.xlu1  ;;  %v543_v12 = vpop.trf.xlu0 }
 0x246   :  { %1325 = vmatprep.mubr.msk.f32.mxu1 %vm330_vm0, %v734_v11  ;;  %1290 = vmatmul.mubr.msk.f32.gmra.mrb[18].mxu0 %vm330_vm0, %v543_v12 }
 0x249   :  { %v735_v13 = vpop.trf.xlu1  ;;  %v572_v14 = vpop.trf.xlu0 }
 0x24a   :  { %1326 = vmatmul.mubr.msk.f32.gmra.mrb[18].mxu1 %vm330_vm0, %v735_v13  ;;  %1292 = vmatprep.mubr.msk.f32.mxu0 %vm330_vm0, %v572_v14 }
 0x24d   :  { %v764_v15 = vpop.trf.xlu1  ;;  %v573_v16 = vpop.trf.xlu0 }
 0x24e   :  { %1328 = vmatprep.mubr.msk.f32.mxu1 %vm330_vm0, %v764_v15  ;;  %1293 = vmatmul.mubr.msk.f32.gmra.mrb[20].mxu0 %vm330_vm0, %v573_v16 }
 0x251   :  { %v765_v17 = vpop.trf.xlu1  ;;  %v574_v18 = vpop.trf.xlu0 }
 0x252   :  { %1329 = vmatmul.mubr.msk.f32.gmra.mrb[20].mxu1 %vm330_vm0, %v765_v17  ;;  %1295 = vmatprep.mubr.msk.f32.mxu0 %vm330_vm0, %v574_v18 }
 0x255   :  { %v766_v19 = vpop.trf.xlu1  ;;  %v575_v20 = vpop.trf.xlu0 }
 0x256   :  { %1331 = vmatprep.mubr.msk.f32.mxu1 %vm330_vm0, %v766_v19  ;;  %1296 = vmatmul.mubr.msk.f32.gmra.mrb[22].mxu0 %vm330_vm0, %v575_v20 }
 0x259   :  { %v767_v21 = vpop.trf.xlu1 }
 0x25a   :  { %1332 = vmatmul.mubr.msk.f32.gmra.mrb[22].mxu1 %vm330_vm0, %v767_v21 }
 0x2f1   :  { %v1300_v22 = vpop.f32.mrb[0].mxu1 }
 0x2f2   :  { %1113 = vst.msk [vmem:[#allocation8 + $0x48] sm:$0xff] %vm1103_vm1, %v1300_v22  ;;  %v984_v23 = vpop.f32.mrb[1].mxu1 }
 0x2f3   :  { %1112 = vst.msk [vmem:[#allocation8 + $0x40] sm:$0xff] %vm1103_vm1, %v984_v23 }
 0x2f9   :  { %v1303_v24 = vpop.f32.mrb[2].mxu1 }
 0x2fa   :  { %1115 = vst.msk [vmem:[#allocation8 + $0x58] sm:$0xff] %vm1103_vm1, %v1303_v24  ;;  %v994_v25 = vpop.f32.mrb[3].mxu1 }
 0x2fb   :  { %1114 = vst.msk [vmem:[#allocation8 + $0x50] sm:$0xff] %vm1103_vm1, %v994_v25 }
 0x2fd   :  { %v1306_v26 = vpop.f32.mrb[4].mxu1 }
 0x2fe   :  { %1117 = vst.msk [vmem:[#allocation8 + $0x68] sm:$0xff] %vm1103_vm1, %v1306_v26  ;;  %v1004_v27 = vpop.f32.mrb[5].mxu1 }
 0x2ff   :  { %1116 = vst.msk [vmem:[#allocation8 + $0x60] sm:$0xff] %vm1103_vm1, %v1004_v27 }
 0x301   :  { %v1309_v28 = vpop.f32.mrb[6].mxu1 }
 0x302   :  { %1119 = vst.msk [vmem:[#allocation8 + $0x78] sm:$0xff] %vm1103_vm1, %v1309_v28  ;;  %v1014_v29 = vpop.f32.mrb[7].mxu1 }
 0x303   :  { %1118 = vst.msk [vmem:[#allocation8 + $0x70] sm:$0xff] %vm1103_vm1, %v1014_v29 }
 0x305   :  { %v1312_v30 = vpop.f32.mrb[8].mxu1 }
 0x306   :  { %1121 = vst.msk [vmem:[#allocation8 + $0x88] sm:$0xff] %vm1103_vm1, %v1312_v30  ;;  %v1024_v31 = vpop.f32.mrb[9].mxu1 }
 0x307   :  { %1120 = vst.msk [vmem:[#allocation8 + $0x80] sm:$0xff] %vm1103_vm1, %v1024_v31 }
 0x309   :  { %v1315_v32 = vpop.f32.mrb[10].mxu1 }
 0x30a   :  { %1123 = vst.msk [vmem:[#allocation8 + $0x98] sm:$0xff] %vm1103_vm1, %v1315_v32  ;;  %v1034_v33 = vpop.f32.mrb[11].mxu1 }
 0x30b   :  { %1122 = vst.msk [vmem:[#allocation8 + $0x90] sm:$0xff] %vm1103_vm1, %v1034_v33 }
 0x30d   :  { %v1318_v34 = vpop.f32.mrb[12].mxu1 }
 0x30e   :  { %1125 = vst.msk [vmem:[#allocation8 + $0xa8] sm:$0xff] %vm1103_vm1, %v1318_v34  ;;  %v1044_v35 = vpop.f32.mrb[13].mxu1 }
 0x30f   :  { %1124 = vst.msk [vmem:[#allocation8 + $0xa0] sm:$0xff] %vm1103_vm1, %v1044_v35 }
 0x311   :  { %v1321_v36 = vpop.f32.mrb[14].mxu1  ;;  %v1288_v37 = vpop.f32.mrb[16].mxu0 }
 0x312   :  { %1127 = vst.msk [vmem:[#allocation8 + $0xb8] sm:$0xff] %vm1103_vm1, %v1321_v36  ;;  %v1054_v38 = vpop.f32.mrb[15].mxu1  ;;  %1105 = vst.msk [vmem:[#allocation8 + $0x8] sm:$0xff] %vm1103_vm1, %v1288_v37  ;;  %v944_v39 = vpop.f32.mrb[17].mxu0 }
 0x313   :  { %1126 = vst.msk [vmem:[#allocation8 + $0xb0] sm:$0xff] %vm1103_vm1, %v1054_v38  ;;  %1104 = vst.msk [vmem:[#allocation8] sm:$0xff] %vm1103_vm1, %v944_v39 }
 0x315   :  { %v1324_v40 = vpop.f32.mrb[16].mxu1 }
 0x316   :  { %1129 = vst.msk [vmem:[#allocation8 + $0xc8] sm:$0xff] %vm1103_vm1, %v1324_v40  ;;  %v1064_v41 = vpop.f32.mrb[17].mxu1 }
 0x317   :  { %1128 = vst.msk [vmem:[#allocation8 + $0xc0] sm:$0xff] %vm1103_vm1, %v1064_v41 }
 0x319   :  { %v1291_v42 = vpop.f32.mrb[18].mxu0 }
 0x31a   :  { %1107 = vst.msk [vmem:[#allocation8 + $0x18] sm:$0xff] %vm1103_vm1, %v1291_v42  ;;  %v954_v43 = vpop.f32.mrb[19].mxu0 }
 0x31b   :  { %1106 = vst.msk [vmem:[#allocation8 + $0x10] sm:$0xff] %vm1103_vm1, %v954_v43 }
 0x31d   :  { %v1327_v44 = vpop.f32.mrb[18].mxu1 }
 0x31e   :  { %1131 = vst.msk [vmem:[#allocation8 + $0xd8] sm:$0xff] %vm1103_vm1, %v1327_v44  ;;  %v1074_v45 = vpop.f32.mrb[19].mxu1 }
 0x31f   :  { %1130 = vst.msk [vmem:[#allocation8 + $0xd0] sm:$0xff] %vm1103_vm1, %v1074_v45 }
 0x321   :  { %v1294_v46 = vpop.f32.mrb[20].mxu0 }
 0x322   :  { %1109 = vst.msk [vmem:[#allocation8 + $0x28] sm:$0xff] %vm1103_vm1, %v1294_v46  ;;  %v964_v47 = vpop.f32.mrb[21].mxu0 }
 0x323   :  { %1108 = vst.msk [vmem:[#allocation8 + $0x20] sm:$0xff] %vm1103_vm1, %v964_v47 }
 0x325   :  { %v1330_v48 = vpop.f32.mrb[20].mxu1 }
 0x326   :  { %1133 = vst.msk [vmem:[#allocation8 + $0xe8] sm:$0xff] %vm1103_vm1, %v1330_v48  ;;  %v1084_v49 = vpop.f32.mrb[21].mxu1 }
 0x327   :  { %1132 = vst.msk [vmem:[#allocation8 + $0xe0] sm:$0xff] %vm1103_vm1, %v1084_v49 }
 0x329   :  { %v1297_v50 = vpop.f32.mrb[22].mxu0 }
 0x32a   :  { %1111 = vst.msk [vmem:[#allocation8 + $0x38] sm:$0xff] %vm1103_vm1, %v1297_v50  ;;  %v974_v51 = vpop.f32.mrb[23].mxu0 }
 0x32b   :  { %1110 = vst.msk [vmem:[#allocation8 + $0x30] sm:$0xff] %vm1103_vm1, %v974_v51 }
 0x32d   :  { %v1333_v52 = vpop.f32.mrb[22].mxu1 }
 0x32e   :  { %1135 = vst.msk [vmem:[#allocation8 + $0xf8] sm:$0xff] %vm1103_vm1, %v1333_v52  ;;  %v1094_v53 = vpop.f32.mrb[23].mxu1 }
 0x32f   :  { %1134 = vst.msk [vmem:[#allocation8 + $0xf0] sm:$0xff] %vm1103_vm1, %v1094_v53 }
 0x330   :  { %1428 = shalt.err (!%p1425_p0)
}
 0x331   :  { %s1429_s27 = scalar_lea.hbm %s1621_s3, 4096 }
 0x332   :  { %p1430_p1 = scmp.ne.s32.totalorder %s1621_s3, %s1429_s27  ;;  %p1433_p2 = scmp.lt.u32.totalorder %s1429_s27, %s1621_s3 }
 0x334   :  { %p1435_p3 = pnand %p1433_p2, %p1430_p1 }
 0x336   :  { %1438 = shalt.err (!%p1435_p3)
}
 0x337   :  { %1147 = dma.vmem_to_hbm [thread:$0]  %s1142_s21, 4096, %s1621_s3, [#allocation4], %s1447_s24, %s1447_s24, %s1448_s25  }
 0x338   :  { %1443 = dma.done.wait [#allocation4], 4096  }
 0x339   :  { %1444 = vsyncadd [#allocation4], 4294963200 }
 0x33a   :  { %1151 = vsyncpa [#allocation3], 1 }
 0x33b   :  { %1152 = vsyncpa [#allocation6], 1 }
 0x33c   :  { %1153 = vsyncpa [#allocation4], 1 }

// kernel: tpu_custom_call.1
= control target key start
LH: loop header
LB: loop body
LE: loop exit
PB: predicated region body
PF: predicated region fallthrough
CT: control target
= control target key end

     0   :  { %8 = vsyncpa [#allocation3], 0  ;;  %s1618_s0 = inlined_call_operand.hbm [shape: f32[16,32], index: 0, kind: input, shape index: {}]   ;;  %s1619_s1 = inlined_call_operand.hbm [shape: f32[16,32], index: 1, kind: input, shape index: {}]   ;;  %s1620_s2 = inlined_call_operand.hbm [shape: f32[8,16,16], index: 2, kind: input, shape index: {}]   ;;  %s1621_s3 = inlined_call_operand.hbm [shape: f32[8,32,32], index: 3, kind: output, shape index: {}]  }
   0x1   :  { %9 = vsyncpa [#allocation6], 0 }
   0x2   :  { %10 = vsyncpa [#allocation4], 0  ;;  %s1445_s12 = smov [#allocation5]   ;;  %s1446_s14 = smov [#allocation2]  }
   0x3   :  { %s28_s13 = sshll.u32 %s1445_s12, 4  ;;  %s16_s15 = sshll.u32 %s1446_s14, 4  ;;  %s29_s13 = int_to_ptr.vmem [resolvable:$true] %s28_s13  ;;  %s1471_s15 = int_to_ptr.vmem [resolvable:$true] %s16_s15 }
   0x4   :  { %s1351_s18 = scalar_lea.hbm %s1619_s1, 256 }
   0x5   :  { %p1352_p0 = scmp.ne.s32.totalorder %s1619_s1, %s1351_s18  ;;  %p1355_p1 = scmp.lt.u32.totalorder %s1351_s18, %s1619_s1 }
   0x7   :  { %p1357_p2 = pnand %p1355_p1, %p1352_p0 }
   0x9   :  { %1360 = shalt.err (!%p1357_p2)
}
   0xa   :  { %s1361_s23 = scalar_lea.vmem %s29_s13, 256  ;;  %p1366_p4 = scmp.lt.s32.totalorder %s29_s13, %s29_s13 }
   0xb   :  { %p1362_p3 = scmp.ne.s32.totalorder %s29_s13, %s1361_s23  ;;  %p1367_p5 = scmp.lt.s32.totalorder %s1361_s23, %s1361_s23 }
   0xd   :  { %p1368_p6 = por %p1367_p5, %p1366_p4 }
   0xf   :  { %p1369_p7 = pnand %p1368_p6, %p1362_p3 }
  0x11   :  { %1372 = shalt.err (!%p1369_p7)
}
  0x12   :  { %s1447_s24 = smov 128   ;;  %s1448_s25 = smov 8  }
  0x13   :  { %34 = dma.hbm_to_vmem [thread:$0]  %s1619_s1, 256, %s29_s13, [#allocation6], %s1447_s24, %s1447_s24, %s1448_s25  }
  0x14   :  { %s1373_s30 = scalar_lea.hbm %s1618_s0, 256 }
  0x15   :  { %p1374_p8 = scmp.ne.s32.totalorder %s1618_s0, %s1373_s30  ;;  %p1377_p9 = scmp.lt.u32.totalorder %s1373_s30, %s1618_s0 }
  0x17   :  { %p1379_p10 = pnand %p1377_p9, %p1374_p8 }
  0x19   :  { %1382 = shalt.err (!%p1379_p10)
}
  0x1a   :  { %s1383_s8 = scalar_lea.vmem %s1471_s15, 256  ;;  %p1388_p12 = scmp.lt.s32.totalorder %s1471_s15, %s1471_s15 }
  0x1b   :  { %p1384_p11 = scmp.ne.s32.totalorder %s1471_s15, %s1383_s8  ;;  %p1389_p13 = scmp.lt.s32.totalorder %s1383_s8, %s1383_s8 }
  0x1d   :  { %p1390_p0 = por %p1389_p13, %p1388_p12 }
  0x1f   :  { %p1391_p1 = pnand %p1390_p0, %p1384_p11 }
  0x21   :  { %1394 = shalt.err (!%p1391_p1)
}
  0x22   :  { %22 = dma.hbm_to_vmem [thread:$0]  %s1618_s0, 256, %s1471_s15, [#allocation3], %s1447_s24, %s1447_s24, %s1448_s25  }
  0x23   :  { %s1449_s10 = smov [#allocation7]   ;;  %s1395_s14 = scalar_lea.hbm %s1620_s2, 2048 }
  0x24   :  { %s40_s11 = sshll.u32 %s1449_s10, 4  ;;  %p1396_p2 = scmp.ne.s32.totalorder %s1620_s2, %s1395_s14  ;;  %s41_s11 = int_to_ptr.vmem [resolvable:$true] %s40_s11 }
  0x25   :  { %p1399_p3 = scmp.lt.u32.totalorder %s1395_s14, %s1620_s2 }
  0x27   :  { %p1401_p4 = pnand %p1399_p3, %p1396_p2 }
  0x29   :  { %1404 = shalt.err (!%p1401_p4)
}
  0x2a   :  { %s1405_s20 = scalar_lea.vmem %s41_s11, 2048  ;;  %p1410_p6 = scmp.lt.s32.totalorder %s41_s11, %s41_s11 }
  0x2b   :  { %p1406_p5 = scmp.ne.s32.totalorder %s41_s11, %s1405_s20  ;;  %p1411_p7 = scmp.lt.s32.totalorder %s1405_s20, %s1405_s20 }
  0x2d   :  { %p1412_p8 = por %p1411_p7, %p1410_p6 }
  0x2f   :  { %p1413_p9 = pnand %p1412_p8, %p1406_p5 }
  0x31   :  { %1416 = shalt.err (!%p1413_p9)
}
  0x32   :  { %46 = dma.hbm_to_vmem [thread:$0]  %s1620_s2, 2048, %s41_s11, [#allocation6], %s1447_s24, %s1447_s24, %s1448_s25  }
  0x33   :  { %1439 = dma.done.wait [#allocation3], 256  }
  0x34   :  { %1440 = vsyncadd [#allocation3], 4294967040 }
  0x35   :  { %1441 = dma.done.wait [#allocation6], 2304  }
  0x36   :  { %1442 = vsyncadd [#allocation6], 4294964992  ;;  %v56_v0 = vld [vmem:[#allocation7] sm:$0xff]  ;;  %v58_v1 = vld [vmem:[#allocation7 + $0x10] sm:$0xff]  ;;  %vm330_vm0 = vcmask 130048   ;;  %vm1103_vm1 = vcmask 261120  }
  0x37   :  { %72 = vxpose.xlu0.b32.start [1/2] (short) (narrow) %v56_v0, 16  ;;  %104 = vxpose.xlu1.b32.start [1/2] (short) (narrow) %v58_v1, 16  ;;  %v57_v2 = vld [vmem:[#allocation7 + $0x8] sm:$0xff]  ;;  %v59_v3 = vld [vmem:[#allocation7 + $0x18] sm:$0xff]  ;;  %v328_v4 = vld [vmem:[#allocation2] sm:$0xff]  ;;  %s1450_s2 = smov [#allocation8]  }
  0x38   :  { %v329_v5 = vld [vmem:[#allocation2 + $0x8] sm:$0xff]  ;;  %v60_v6 = vld [vmem:[#allocation7 + $0x20] sm:$0xff]  ;;  %v62_v7 = vld [vmem:[#allocation7 + $0x30] sm:$0xff]  ;;  %s1141_s21 = sshll.u32 %s1450_s2, 4  ;;  %s1142_s21 = int_to_ptr.vmem [resolvable:$true] %s1141_s21 }
  0x39   :  { %v1334_v8 = vpack.c.bf16 %v329_v5, %v328_v4  ;;  %v61_v9 = vld [vmem:[#allocation7 + $0x28] sm:$0xff]  ;;  %v63_v10 = vld [vmem:[#allocation7 + $0x38] sm:$0xff]  ;;  %v64_v11 = vld [vmem:[#allocation7 + $0x40] sm:$0xff]  ;;  %s1417_s22 = scalar_lea.vmem %s1142_s21, 4096  ;;  %p1422_p11 = scmp.lt.s32.totalorder %s1142_s21, %s1142_s21 }
  0x3a   :  { %v66_v12 = vld [vmem:[#allocation7 + $0x50] sm:$0xff]  ;;  %v65_v13 = vld [vmem:[#allocation7 + $0x48] sm:$0xff]  ;;  %v67_v14 = vld [vmem:[#allocation7 + $0x58] sm:$0xff]  ;;  %p1418_p10 = scmp.ne.s32.totalorder %s1142_s21, %s1417_s22  ;;  %p1423_p12 = scmp.lt.s32.totalorder %s1417_s22, %s1417_s22 }
  0x3b   :  { %73 = vxpose.xlu0.b32.end [2/2] (short) (narrow) %v57_v2, 16  ;;  %105 = vxpose.xlu1.b32.end [2/2] (short) (narrow) %v59_v3, 16  ;;  %v68_v15 = vld [vmem:[#allocation7 + $0x60] sm:$0xff]  ;;  %v70_v16 = vld [vmem:[#allocation7 + $0x70] sm:$0xff]  ;;  %v69_v17 = vld [vmem:[#allocation7 + $0x68] sm:$0xff] }
  0x3c   :  { %1335 = vmatprep.subr.bf16.mxu0 %v1334_v8  ;;  %v71_v18 = vld [vmem:[#allocation7 + $0x78] sm:$0xff]  ;;  %v780_v41 = vld [vmem:[#allocation5] sm:$0xff]  ;;  %p1424_p13 = por %p1423_p12, %p1422_p11 }
  0x3d   :  { %1337 = vmatpush3.bf16.msra.mxu0 %v1334_v8  ;;  %v781_v42 = vld [vmem:[#allocation5 + $0x8] sm:$0xff] }
  0x3e   :  { %v1338_v43 = vpack.c.bf16 %v781_v42, %v780_v41  ;;  %p1425_p0 = pnand %p1424_p13, %p1418_p10 }
  0x3f   :  { %136 = vxpose.xlu0.b32.start [1/2] (short) (narrow) %v60_v6, 16  ;;  %168 = vxpose.xlu1.b32.start [1/2] (short) (narrow) %v62_v7, 16 }
  0x40   :  { %1342 = vmatprep.subr.bf16.mxu1 %v1338_v43  ;;  %1339 = vmatprep.subr.bf16.mxu0 %v1338_v43 }
  0x41   :  { %1343 = vmatpush3.bf16.msra.mxu1 %v1338_v43 }
  0x43   :  { %137 = vxpose.xlu0.b32.end [2/2] (short) (narrow) %v61_v9, 16  ;;  %169 = vxpose.xlu1.b32.end [2/2] (short) (narrow) %v63_v10, 16 }
  0x47   :  { %200 = vxpose.xlu0.b32.start [1/2] (short) (narrow) %v64_v11, 16  ;;  %232 = vxpose.xlu1.b32.start [1/2] (short) (narrow) %v66_v12, 16 }
  0x4b   :  { %201 = vxpose.xlu0.b32.end [2/2] (short) (narrow) %v65_v13, 16  ;;  %233 = vxpose.xlu1.b32.end [2/2] (short) (narrow) %v67_v14, 16 }
  0x4f   :  { %264 = vxpose.xlu0.b32.start [1/2] (short) (narrow) %v68_v15, 16  ;;  %296 = vxpose.xlu1.b32.start [1/2] (short) (narrow) %v70_v16, 16 }
  0x53   :  { %265 = vxpose.xlu0.b32.end [2/2] (short) (narrow) %v69_v17, 16  ;;  %297 = vxpose.xlu1.b32.end [2/2] (short) (narrow) %v71_v18, 16 }
  0xb7   :  { %v88_v19 = vpop.trf.xlu0  ;;  %v120_v20 = vpop.trf.xlu1 }
  0xb8   :  { %1258 = vmatprep.mubr.msk.f32.mxu0 %vm330_vm0, %v88_v19 }
  0xbb   :  { %v89_v21 = vpop.trf.xlu0  ;;  %v121_v22 = vpop.trf.xlu1 }
  0xbc   :  { %1259 = vmatmul.mubr.msk.f32.vlgmr.msra.gmra.mrb[0].mxu0 %vm330_vm0, %v89_v21 }
  0xbd   :  { %1261 = vmatprep.mubr.msk.f32.mxu0 %vm330_vm0, %v120_v20  ;;  %1341 = vmatpush3.bf16.msra.mxu0 %v1338_v43 }
  0xbf   :  { %v152_v23 = vpop.trf.xlu0  ;;  %v184_v24 = vpop.trf.xlu1 }
  0xc0   :  { %1262 = vmatmul.mubr.msk.f32.gmra.mrb[2].mxu0 %vm330_vm0, %v121_v22 }
  0xc1   :  { %1264 = vmatprep.mubr.msk.f32.mxu0 %vm330_vm0, %v152_v23 }
  0xc3   :  { %v153_v25 = vpop.trf.xlu0  ;;  %v185_v26 = vpop.trf.xlu1 }
  0xc4   :  { %1265 = vmatmul.mubr.msk.f32.gmra.mrb[4].mxu0 %vm330_vm0, %v153_v25 }
  0xc5   :  { %1267 = vmatprep.mubr.msk.f32.mxu0 %vm330_vm0, %v184_v24 }
  0xc7   :  { %v216_v27 = vpop.trf.xlu0  ;;  %v248_v28 = vpop.trf.xlu1 }
  0xc8   :  { %1268 = vmatmul.mubr.msk.f32.gmra.mrb[6].mxu0 %vm330_vm0, %v185_v26 }
  0xc9   :  { %1270 = vmatprep.mubr.msk.f32.mxu0 %vm330_vm0, %v216_v27 }
  0xcb   :  { %v217_v29 = vpop.trf.xlu0  ;;  %v249_v30 = vpop.trf.xlu1 }
  0xcc   :  { %1271 = vmatmul.mubr.msk.f32.gmra.mrb[8].mxu0 %vm330_vm0, %v217_v29 }
  0xcd   :  { %1273 = vmatprep.mubr.msk.f32.mxu0 %vm330_vm0, %v248_v28 }
  0xcf   :  { %v280_v31 = vpop.trf.xlu0  ;;  %v312_v32 = vpop.trf.xlu1 }
  0xd0   :  { %1274 = vmatmul.mubr.msk.f32.gmra.mrb[10].mxu0 %vm330_vm0, %v249_v30 }
  0xd1   :  { %1276 = vmatprep.mubr.msk.f32.mxu0 %vm330_vm0, %v280_v31 }
  0xd3   :  { %v281_v33 = vpop.trf.xlu0  ;;  %v313_v34 = vpop.trf.xlu1 }
  0xd4   :  { %1277 = vmatmul.mubr.msk.f32.gmra.mrb[12].mxu0 %vm330_vm0, %v281_v33 }
  0xd5   :  { %1279 = vmatprep.mubr.msk.f32.mxu0 %vm330_vm0, %v312_v32 }
  0xd8   :  { %1280 = vmatmul.mubr.msk.f32.gmra.mrb[14].mxu0 %vm330_vm0, %v313_v34 }
 0x18f   :  { %v1260_v35 = vpop.f32.mrb[0].mxu0 }
 0x190   :  { %v445_v36 = vpop.f32.mrb[1].mxu0 }
 0x193   :  { %v1263_v37 = vpop.f32.mrb[2].mxu0 }
 0x194   :  { %v455_v38 = vpop.f32.mrb[3].mxu0 }
 0x197   :  { %v1266_v39 = vpop.f32.mrb[4].mxu0 }
 0x198   :  { %v465_v40 = vpop.f32.mrb[5].mxu0 }
 0x199   :  { %588 = vxpose.xlu0.b32.start [1/2] (short) (narrow) %v465_v40, 32 }
 0x19b   :  { %v1269_v44 = vpop.f32.mrb[6].mxu0 }
 0x19c   :  { %v475_v45 = vpop.f32.mrb[7].mxu0 }
 0x19d   :  { %589 = vxpose.xlu0.b32.end [2/2] (short) (narrow) %v1266_v39, 32  ;;  %620 = vxpose.xlu1.b32.start [1/2] (short) (narrow) %v475_v45, 32 }
 0x19f   :  { %v1272_v46 = vpop.f32.mrb[8].mxu0 }
 0x1a0   :  { %v485_v47 = vpop.f32.mrb[9].mxu0 }
 0x1a1   :  { %621 = vxpose.xlu1.b32.end [2/2] (short) (narrow) %v1269_v44, 32 }
 0x1a3   :  { %v1275_v48 = vpop.f32.mrb[10].mxu0 }
 0x1a4   :  { %v495_v49 = vpop.f32.mrb[11].mxu0 }
 0x1a6   :  { %652 = vxpose.xlu0.b32.start [1/2] (short) (narrow) %v485_v47, 32 }
 0x1a7   :  { %v1278_v50 = vpop.f32.mrb[12].mxu0 }
 0x1a8   :  { %v505_v51 = vpop.f32.mrb[13].mxu0 }
 0x1aa   :  { %653 = vxpose.xlu0.b32.end [2/2] (short) (narrow) %v1272_v46, 32  ;;  %684 = vxpose.xlu1.b32.start [1/2] (short) (narrow) %v495_v49, 32 }
 0x1ab   :  { %v1281_v52 = vpop.f32.mrb[14].mxu0 }
 0x1ac   :  { %v515_v53 = vpop.f32.mrb[15].mxu0 }
 0x1ae   :  { %685 = vxpose.xlu1.b32.end [2/2] (short) (narrow) %v1275_v48, 32 }
 0x1b3   :  { %524 = vxpose.xlu0.b32.start [1/2] (short) (narrow) %v445_v36, 32 }
 0x1b7   :  { %525 = vxpose.xlu0.b32.end [2/2] (short) (narrow) %v1260_v35, 32  ;;  %716 = vxpose.xlu1.b32.start [1/2] (short) (narrow) %v505_v51, 32 }
 0x1bb   :  { %717 = vxpose.xlu1.b32.end [2/2] (short) (narrow) %v1278_v50, 32 }
 0x1c0   :  { %556 = vxpose.xlu0.b32.start [1/2] (short) (narrow) %v455_v38, 32 }
 0x1c4   :  { %557 = vxpose.xlu0.b32.end [2/2] (short) (narrow) %v1263_v37, 32  ;;  %748 = vxpose.xlu1.b32.start [1/2] (short) (narrow) %v515_v53, 32 }
 0x1c8   :  { %749 = vxpose.xlu1.b32.end [2/2] (short) (narrow) %v1281_v52, 32 }
 0x219   :  { %v604_v54 = vpop.trf.xlu0 }
 0x21a   :  { %1298 = vmatprep.mubr.msk.f32.mxu1 %vm330_vm0, %v604_v54 }
 0x21d   :  { %v636_v55 = vpop.trf.xlu1  ;;  %v605_v56 = vpop.trf.xlu0 }
 0x21e   :  { %1299 = vmatmul.mubr.msk.f32.vlgmr.msra.gmra.mrb[0].mxu1 %vm330_vm0, %v605_v56 }
 0x221   :  { %v637_v57 = vpop.trf.xlu1  ;;  %v606_v58 = vpop.trf.xlu0 }
 0x222   :  { %1301 = vmatprep.mubr.msk.f32.mxu1 %vm330_vm0, %v606_v58 }
 0x225   :  { %v638_v59 = vpop.trf.xlu1  ;;  %v607_v60 = vpop.trf.xlu0 }
 0x226   :  { %1302 = vmatmul.mubr.msk.f32.gmra.mrb[2].mxu1 %vm330_vm0, %v607_v60 }
 0x227   :  { %1304 = vmatprep.mubr.msk.f32.mxu1 %vm330_vm0, %v636_v55 }
 0x229   :  { %v639_v61 = vpop.trf.xlu1  ;;  %v668_v62 = vpop.trf.xlu0 }
 0x22a   :  { %1305 = vmatmul.mubr.msk.f32.gmra.mrb[4].mxu1 %vm330_vm0, %v637_v57 }
 0x22b   :  { %1307 = vmatprep.mubr.msk.f32.mxu1 %vm330_vm0, %v638_v59 }
 0x22d   :  { %v700_v63 = vpop.trf.xlu1  ;;  %v669_v0 = vpop.trf.xlu0 }
 0x22e   :  { %1308 = vmatmul.mubr.msk.f32.gmra.mrb[6].mxu1 %vm330_vm0, %v639_v61 }
 0x22f   :  { %1310 = vmatprep.mubr.msk.f32.mxu1 %vm330_vm0, %v668_v62 }
 0x231   :  { %v701_v1 = vpop.trf.xlu1  ;;  %v670_v2 = vpop.trf.xlu0 }
 0x232   :  { %1311 = vmatmul.mubr.msk.f32.gmra.mrb[8].mxu1 %vm330_vm0, %v669_v0 }
 0x233   :  { %1313 = vmatprep.mubr.msk.f32.mxu1 %vm330_vm0, %v670_v2 }
 0x235   :  { %v702_v3 = vpop.trf.xlu1  ;;  %v671_v4 = vpop.trf.xlu0 }
 0x236   :  { %1314 = vmatmul.mubr.msk.f32.gmra.mrb[10].mxu1 %vm330_vm0, %v671_v4 }
 0x237   :  { %1316 = vmatprep.mubr.msk.f32.mxu1 %vm330_vm0, %v700_v63 }
 0x239   :  { %v703_v5 = vpop.trf.xlu1  ;;  %v540_v6 = vpop.trf.xlu0 }
 0x23a   :  { %1317 = vmatmul.mubr.msk.f32.gmra.mrb[12].mxu1 %vm330_vm0, %v701_v1  ;;  %1286 = vmatprep.mubr.msk.f32.mxu0 %vm330_vm0, %v540_v6 }
 0x23b   :  { %1319 = vmatprep.mubr.msk.f32.mxu1 %vm330_vm0, %v702_v3 }
 0x23d   :  { %v732_v7 = vpop.trf.xlu1  ;;  %v541_v8 = vpop.trf.xlu0 }
 0x23e   :  { %1320 = vmatmul.mubr.msk.f32.gmra.mrb[14].mxu1 %vm330_vm0, %v703_v5  ;;  %1287 = vmatmul.mubr.msk.f32.vlgmr.msra.gmra.mrb[16].mxu0 %vm330_vm0, %v541_v8 }
 0x23f   :  { %1322 = vmatprep.mubr.msk.f32.mxu1 %vm330_vm0, %v732_v7 }
 0x241   :  { %v733_v9 = vpop.trf.xlu1  ;;  %v542_v10 = vpop.trf.xlu0 }
 0x242   :  { %1323 = vmatmul.mubr.msk.f32.gmra.mrb[16].mxu1 %vm330_vm0, %v733_v9  ;;  %1289 = vmatprep.mubr.msk.f32.mxu0 %vm330_vm0, %v542_v10 }
 0x245   :  { %v734_v11 = vpop.trf.xlu1  ;;  %v543_v12 = vpop.trf.xlu0 }
 0x246   :  { %1325 = vmatprep.mubr.msk.f32.mxu1 %vm330_vm0, %v734_v11  ;;  %1290 = vmatmul.mubr.msk.f32.gmra.mrb[18].mxu0 %vm330_vm0, %v543_v12 }
 0x249   :  { %v735_v13 = vpop.trf.xlu1  ;;  %v572_v14 = vpop.trf.xlu0 }
 0x24a   :  { %1326 = vmatmul.mubr.msk.f32.gmra.mrb[18].mxu1 %vm330_vm0, %v735_v13  ;;  %1292 = vmatprep.mubr.msk.f32.mxu0 %vm330_vm0, %v572_v14 }
 0x24d   :  { %v764_v15 = vpop.trf.xlu1  ;;  %v573_v16 = vpop.trf.xlu0 }
 0x24e   :  { %1328 = vmatprep.mubr.msk.f32.mxu1 %vm330_vm0, %v764_v15  ;;  %1293 = vmatmul.mubr.msk.f32.gmra.mrb[20].mxu0 %vm330_vm0, %v573_v16 }
 0x251   :  { %v765_v17 = vpop.trf.xlu1  ;;  %v574_v18 = vpop.trf.xlu0 }
 0x252   :  { %1329 = vmatmul.mubr.msk.f32.gmra.mrb[20].mxu1 %vm330_vm0, %v765_v17  ;;  %1295 = vmatprep.mubr.msk.f32.mxu0 %vm330_vm0, %v574_v18 }
 0x255   :  { %v766_v19 = vpop.trf.xlu1  ;;  %v575_v20 = vpop.trf.xlu0 }
 0x256   :  { %1331 = vmatprep.mubr.msk.f32.mxu1 %vm330_vm0, %v766_v19  ;;  %1296 = vmatmul.mubr.msk.f32.gmra.mrb[22].mxu0 %vm330_vm0, %v575_v20 }
 0x259   :  { %v767_v21 = vpop.trf.xlu1 }
 0x25a   :  { %1332 = vmatmul.mubr.msk.f32.gmra.mrb[22].mxu1 %vm330_vm0, %v767_v21 }
 0x2f1   :  { %v1300_v22 = vpop.f32.mrb[0].mxu1 }
 0x2f2   :  { %1113 = vst.msk [vmem:[#allocation8 + $0x48] sm:$0xff] %vm1103_vm1, %v1300_v22  ;;  %v984_v23 = vpop.f32.mrb[1].mxu1 }
 0x2f3   :  { %1112 = vst.msk [vmem:[#allocation8 + $0x40] sm:$0xff] %vm1103_vm1, %v984_v23 }
 0x2f9   :  { %v1303_v24 = vpop.f32.mrb[2].mxu1 }
 0x2fa   :  { %1115 = vst.msk [vmem:[#allocation8 + $0x58] sm:$0xff] %vm1103_vm1, %v1303_v24  ;;  %v994_v25 = vpop.f32.mrb[3].mxu1 }
 0x2fb   :  { %1114 = vst.msk [vmem:[#allocation8 + $0x50] sm:$0xff] %vm1103_vm1, %v994_v25 }
 0x2fd   :  { %v1306_v26 = vpop.f32.mrb[4].mxu1 }
 0x2fe   :  { %1117 = vst.msk [vmem:[#allocation8 + $0x68] sm:$0xff] %vm1103_vm1, %v1306_v26  ;;  %v1004_v27 = vpop.f32.mrb[5].mxu1 }
 0x2ff   :  { %1116 = vst.msk [vmem:[#allocation8 + $0x60] sm:$0xff] %vm1103_vm1, %v1004_v27 }
 0x301   :  { %v1309_v28 = vpop.f32.mrb[6].mxu1 }
 0x302   :  { %1119 = vst.msk [vmem:[#allocation8 + $0x78] sm:$0xff] %vm1103_vm1, %v1309_v28  ;;  %v1014_v29 = vpop.f32.mrb[7].mxu1 }
 0x303   :  { %1118 = vst.msk [vmem:[#allocation8 + $0x70] sm:$0xff] %vm1103_vm1, %v1014_v29 }
 0x305   :  { %v1312_v30 = vpop.f32.mrb[8].mxu1 }
 0x306   :  { %1121 = vst.msk [vmem:[#allocation8 + $0x88] sm:$0xff] %vm1103_vm1, %v1312_v30  ;;  %v1024_v31 = vpop.f32.mrb[9].mxu1 }
 0x307   :  { %1120 = vst.msk [vmem:[#allocation8 + $0x80] sm:$0xff] %vm1103_vm1, %v1024_v31 }
 0x309   :  { %v1315_v32 = vpop.f32.mrb[10].mxu1 }
 0x30a   :  { %1123 = vst.msk [vmem:[#allocation8 + $0x98] sm:$0xff] %vm1103_vm1, %v1315_v32  ;;  %v1034_v33 = vpop.f32.mrb[11].mxu1 }
 0x30b   :  { %1122 = vst.msk [vmem:[#allocation8 + $0x90] sm:$0xff] %vm1103_vm1, %v1034_v33 }
 0x30d   :  { %v1318_v34 = vpop.f32.mrb[12].mxu1 }
 0x30e   :  { %1125 = vst.msk [vmem:[#allocation8 + $0xa8] sm:$0xff] %vm1103_vm1, %v1318_v34  ;;  %v1044_v35 = vpop.f32.mrb[13].mxu1 }
 0x30f   :  { %1124 = vst.msk [vmem:[#allocation8 + $0xa0] sm:$0xff] %vm1103_vm1, %v1044_v35 }
 0x311   :  { %v1321_v36 = vpop.f32.mrb[14].mxu1  ;;  %v1288_v37 = vpop.f32.mrb[16].mxu0 }
 0x312   :  { %1127 = vst.msk [vmem:[#allocation8 + $0xb8] sm:$0xff] %vm1103_vm1, %v1321_v36  ;;  %v1054_v38 = vpop.f32.mrb[15].mxu1  ;;  %1105 = vst.msk [vmem:[#allocation8 + $0x8] sm:$0xff] %vm1103_vm1, %v1288_v37  ;;  %v944_v39 = vpop.f32.mrb[17].mxu0 }
 0x313   :  { %1126 = vst.msk [vmem:[#allocation8 + $0xb0] sm:$0xff] %vm1103_vm1, %v1054_v38  ;;  %1104 = vst.msk [vmem:[#allocation8] sm:$0xff] %vm1103_vm1, %v944_v39 }
 0x315   :  { %v1324_v40 = vpop.f32.mrb[16].mxu1 }
 0x316   :  { %1129 = vst.msk [vmem:[#allocation8 + $0xc8] sm:$0xff] %vm1103_vm1, %v1324_v40  ;;  %v1064_v41 = vpop.f32.mrb[17].mxu1 }
 0x317   :  { %1128 = vst.msk [vmem:[#allocation8 + $0xc0] sm:$0xff] %vm1103_vm1, %v1064_v41 }
 0x319   :  { %v1291_v42 = vpop.f32.mrb[18].mxu0 }
 0x31a   :  { %1107 = vst.msk [vmem:[#allocation8 + $0x18] sm:$0xff] %vm1103_vm1, %v1291_v42  ;;  %v954_v43 = vpop.f32.mrb[19].mxu0 }
 0x31b   :  { %1106 = vst.msk [vmem:[#allocation8 + $0x10] sm:$0xff] %vm1103_vm1, %v954_v43 }
 0x31d   :  { %v1327_v44 = vpop.f32.mrb[18].mxu1 }
 0x31e   :  { %1131 = vst.msk [vmem:[#allocation8 + $0xd8] sm:$0xff] %vm1103_vm1, %v1327_v44  ;;  %v1074_v45 = vpop.f32.mrb[19].mxu1 }
 0x31f   :  { %1130 = vst.msk [vmem:[#allocation8 + $0xd0] sm:$0xff] %vm1103_vm1, %v1074_v45 }
 0x321   :  { %v1294_v46 = vpop.f32.mrb[20].mxu0 }
 0x322   :  { %1109 = vst.msk [vmem:[#allocation8 + $0x28] sm:$0xff] %vm1103_vm1, %v1294_v46  ;;  %v964_v47 = vpop.f32.mrb[21].mxu0 }
 0x323   :  { %1108 = vst.msk [vmem:[#allocation8 + $0x20] sm:$0xff] %vm1103_vm1, %v964_v47 }
 0x325   :  { %v1330_v48 = vpop.f32.mrb[20].mxu1 }
 0x326   :  { %1133 = vst.msk [vmem:[#allocation8 + $0xe8] sm:$0xff] %vm1103_vm1, %v1330_v48  ;;  %v1084_v49 = vpop.f32.mrb[21].mxu1 }
 0x327   :  { %1132 = vst.msk [vmem:[#allocation8 + $0xe0] sm:$0xff] %vm1103_vm1, %v1084_v49 }
 0x329   :  { %v1297_v50 = vpop.f32.mrb[22].mxu0 }
 0x32a   :  { %1111 = vst.msk [vmem:[#allocation8 + $0x38] sm:$0xff] %vm1103_vm1, %v1297_v50  ;;  %v974_v51 = vpop.f32.mrb[23].mxu0 }
 0x32b   :  { %1110 = vst.msk [vmem:[#allocation8 + $0x30] sm:$0xff] %vm1103_vm1, %v974_v51 }
 0x32d   :  { %v1333_v52 = vpop.f32.mrb[22].mxu1 }
 0x32e   :  { %1135 = vst.msk [vmem:[#allocation8 + $0xf8] sm:$0xff] %vm1103_vm1, %v1333_v52  ;;  %v1094_v53 = vpop.f32.mrb[23].mxu1 }
 0x32f   :  { %1134 = vst.msk [vmem:[#allocation8 + $0xf0] sm:$0xff] %vm1103_vm1, %v1094_v53 }
 0x330   :  { %1428 = shalt.err (!%p1425_p0)
}
 0x331   :  { %s1429_s27 = scalar_lea.hbm %s1621_s3, 4096 }
 0x332   :  { %p1430_p1 = scmp.ne.s32.totalorder %s1621_s3, %s1429_s27  ;;  %p1433_p2 = scmp.lt.u32.totalorder %s1429_s27, %s1621_s3 }
 0x334   :  { %p1435_p3 = pnand %p1433_p2, %p1430_p1 }
 0x336   :  { %1438 = shalt.err (!%p1435_p3)
}
 0x337   :  { %1147 = dma.vmem_to_hbm [thread:$0]  %s1142_s21, 4096, %s1621_s3, [#allocation4], %s1447_s24, %s1447_s24, %s1448_s25  }
 0x338   :  { %1443 = dma.done.wait [#allocation4], 4096  }
 0x339   :  { %1444 = vsyncadd [#allocation4], 4294963200 }
 0x33a   :  { %1151 = vsyncpa [#allocation3], 1 }
 0x33b   :  { %1152 = vsyncpa [#allocation6], 1 }
 0x33c   :  { %1153 = vsyncpa [#allocation4], 1 }

// kernel: tpu_custom_call.1
= control target key start
LH: loop header
LB: loop body
LE: loop exit
PB: predicated region body
PF: predicated region fallthrough
CT: control target
= control target key end

     0   :  { %8 = vsyncpa [#allocation3], 0  ;;  %s1614_s0 = inlined_call_operand.hbm [shape: f32[16,32], index: 0, kind: input, shape index: {}]   ;;  %s1615_s1 = inlined_call_operand.hbm [shape: f32[16,32], index: 1, kind: input, shape index: {}]   ;;  %s1616_s2 = inlined_call_operand.hbm [shape: f32[8,16,16], index: 2, kind: input, shape index: {}]   ;;  %s1617_s3 = inlined_call_operand.hbm [shape: f32[8,32,32], index: 3, kind: output, shape index: {}]  }
   0x1   :  { %9 = vsyncpa [#allocation6], 0 }
   0x2   :  { %10 = vsyncpa [#allocation4], 0  ;;  %s1411_s12 = smov [#allocation5]   ;;  %s1412_s14 = smov [#allocation2]  }
   0x3   :  { %s28_s13 = sshll.u32 %s1411_s12, 4  ;;  %s16_s15 = sshll.u32 %s1412_s14, 4  ;;  %s29_s13 = int_to_ptr.vmem [resolvable:$true] %s28_s13  ;;  %s1437_s15 = int_to_ptr.vmem [resolvable:$true] %s16_s15 }
   0x4   :  { %s1317_s18 = scalar_lea.hbm %s1615_s1, 256 }
   0x5   :  { %p1318_p0 = scmp.ne.s32.totalorder %s1615_s1, %s1317_s18  ;;  %p1321_p1 = scmp.lt.u32.totalorder %s1317_s18, %s1615_s1 }
   0x7   :  { %p1323_p2 = pnand %p1321_p1, %p1318_p0 }
   0x9   :  { %1326 = shalt.err (!%p1323_p2)
}
   0xa   :  { %s1327_s23 = scalar_lea.vmem %s29_s13, 256  ;;  %p1332_p4 = scmp.lt.s32.totalorder %s29_s13, %s29_s13 }
   0xb   :  { %p1328_p3 = scmp.ne.s32.totalorder %s29_s13, %s1327_s23  ;;  %p1333_p5 = scmp.lt.s32.totalorder %s1327_s23, %s1327_s23 }
   0xd   :  { %p1334_p6 = por %p1333_p5, %p1332_p4 }
   0xf   :  { %p1335_p7 = pnand %p1334_p6, %p1328_p3 }
  0x11   :  { %1338 = shalt.err (!%p1335_p7)
}
  0x12   :  { %s1413_s24 = smov 128   ;;  %s1414_s25 = smov 8  }
  0x13   :  { %34 = dma.hbm_to_vmem [thread:$0]  %s1615_s1, 256, %s29_s13, [#allocation6], %s1413_s24, %s1413_s24, %s1414_s25  }
  0x14   :  { %s1339_s30 = scalar_lea.hbm %s1614_s0, 256 }
  0x15   :  { %p1340_p8 = scmp.ne.s32.totalorder %s1614_s0, %s1339_s30  ;;  %p1343_p9 = scmp.lt.u32.totalorder %s1339_s30, %s1614_s0 }
  0x17   :  { %p1345_p10 = pnand %p1343_p9, %p1340_p8 }
  0x19   :  { %1348 = shalt.err (!%p1345_p10)
}
  0x1a   :  { %s1349_s8 = scalar_lea.vmem %s1437_s15, 256  ;;  %p1354_p12 = scmp.lt.s32.totalorder %s1437_s15, %s1437_s15 }
  0x1b   :  { %p1350_p11 = scmp.ne.s32.totalorder %s1437_s15, %s1349_s8  ;;  %p1355_p13 = scmp.lt.s32.totalorder %s1349_s8, %s1349_s8 }
  0x1d   :  { %p1356_p0 = por %p1355_p13, %p1354_p12 }
  0x1f   :  { %p1357_p1 = pnand %p1356_p0, %p1350_p11 }
  0x21   :  { %1360 = shalt.err (!%p1357_p1)
}
  0x22   :  { %22 = dma.hbm_to_vmem [thread:$0]  %s1614_s0, 256, %s1437_s15, [#allocation3], %s1413_s24, %s1413_s24, %s1414_s25  }
  0x23   :  { %s1415_s10 = smov [#allocation7]   ;;  %s1361_s14 = scalar_lea.hbm %s1616_s2, 2048 }
  0x24   :  { %s40_s11 = sshll.u32 %s1415_s10, 4  ;;  %p1362_p2 = scmp.ne.s32.totalorder %s1616_s2, %s1361_s14  ;;  %s41_s11 = int_to_ptr.vmem [resolvable:$true] %s40_s11 }
  0x25   :  { %p1365_p3 = scmp.lt.u32.totalorder %s1361_s14, %s1616_s2 }
  0x27   :  { %p1367_p4 = pnand %p1365_p3, %p1362_p2 }
  0x29   :  { %1370 = shalt.err (!%p1367_p4)
}
  0x2a   :  { %s1371_s20 = scalar_lea.vmem %s41_s11, 2048  ;;  %p1376_p6 = scmp.lt.s32.totalorder %s41_s11, %s41_s11 }
  0x2b   :  { %p1372_p5 = scmp.ne.s32.totalorder %s41_s11, %s1371_s20  ;;  %p1377_p7 = scmp.lt.s32.totalorder %s1371_s20, %s1371_s20 }
  0x2d   :  { %p1378_p8 = por %p1377_p7, %p1376_p6 }
  0x2f   :  { %p1379_p9 = pnand %p1378_p8, %p1372_p5 }
  0x31   :  { %1382 = shalt.err (!%p1379_p9)
}
  0x32   :  { %46 = dma.hbm_to_vmem [thread:$0]  %s1616_s2, 2048, %s41_s11, [#allocation6], %s1413_s24, %s1413_s24, %s1414_s25  }
  0x33   :  { %1405 = dma.done.wait [#allocation3], 256  }
  0x34   :  { %1406 = vsyncadd [#allocation3], 4294967040 }
  0x35   :  { %1407 = dma.done.wait [#allocation6], 2304  }
  0x36   :  { %1408 = vsyncadd [#allocation6], 4294964992  ;;  %vm74_vm0 = vcmask 130048   ;;  %v72_v0 = vld [vmem:[#allocation5] sm:$0xff]  ;;  %v73_v1 = vld [vmem:[#allocation5 + $0x8] sm:$0xff]  ;;  %vm399_vm1 = vcmask 261120  }
  0x37   :  { %v56_v2 = vld [vmem:[#allocation7] sm:$0xff]  ;;  %v1274_v3 = vpack.c.bf16 %v73_v1, %v72_v0  ;;  %v57_v4 = vld [vmem:[#allocation7 + $0x8] sm:$0xff]  ;;  %v58_v5 = vld [vmem:[#allocation7 + $0x10] sm:$0xff]  ;;  %s1416_s2 = smov [#allocation8]  }
  0x38   :  { %1170 = vmatprep.mubr.msk.f32.mxu0 %vm74_vm0, %v56_v2  ;;  %v268_v6 = vld [vmem:[#allocation2] sm:$0xff]  ;;  %v59_v7 = vld [vmem:[#allocation7 + $0x18] sm:$0xff]  ;;  %v269_v8 = vld [vmem:[#allocation2 + $0x8] sm:$0xff]  ;;  %s1039_s21 = sshll.u32 %s1416_s2, 4  ;;  %s1040_s21 = int_to_ptr.vmem [resolvable:$true] %s1039_s21 }
  0x39   :  { %1275 = vmatprep.subr.bf16.mxu0 %v1274_v3  ;;  %270 = vxpose.xlu0.b32.start [1/2] (short) (narrow) %v268_v6, 32  ;;  %v60_v9 = vld [vmem:[#allocation7 + $0x20] sm:$0xff]  ;;  %v61_v10 = vld [vmem:[#allocation7 + $0x28] sm:$0xff]  ;;  %v62_v11 = vld [vmem:[#allocation7 + $0x30] sm:$0xff]  ;;  %s1383_s22 = scalar_lea.vmem %s1040_s21, 4096  ;;  %p1388_p11 = scmp.lt.s32.totalorder %s1040_s21, %s1040_s21 }
  0x3a   :  { %1277 = vmatpush3.bf16.msra.mxu0 %v1274_v3  ;;  %v63_v12 = vld [vmem:[#allocation7 + $0x38] sm:$0xff]  ;;  %v64_v13 = vld [vmem:[#allocation7 + $0x40] sm:$0xff]  ;;  %v65_v14 = vld [vmem:[#allocation7 + $0x48] sm:$0xff]  ;;  %p1384_p10 = scmp.ne.s32.totalorder %s1040_s21, %s1383_s22  ;;  %p1389_p12 = scmp.lt.s32.totalorder %s1383_s22, %s1383_s22 }
  0x3b   :  { %v66_v15 = vld [vmem:[#allocation7 + $0x50] sm:$0xff]  ;;  %v67_v16 = vld [vmem:[#allocation7 + $0x58] sm:$0xff]  ;;  %v68_v17 = vld [vmem:[#allocation7 + $0x60] sm:$0xff] }
  0x3c   :  { %v69_v18 = vld [vmem:[#allocation7 + $0x68] sm:$0xff]  ;;  %v70_v19 = vld [vmem:[#allocation7 + $0x70] sm:$0xff]  ;;  %v71_v20 = vld [vmem:[#allocation7 + $0x78] sm:$0xff]  ;;  %p1390_p13 = por %p1389_p12, %p1388_p11 }
  0x3d   :  { %1171 = vmatmul.mubr.msk.f32.vlgmr.msra.gmra.mrb[0].mxu0 %vm74_vm0, %v57_v4  ;;  %271 = vxpose.xlu0.b32.end [2/2] (short) (narrow) %v269_v8, 32 }
  0x3e   :  { %1173 = vmatprep.mubr.msk.f32.mxu0 %vm74_vm0, %v58_v5  ;;  %p1391_p0 = pnand %p1390_p13, %p1384_p10 }
  0x41   :  { %1174 = vmatmul.mubr.msk.f32.gmra.mrb[2].mxu0 %vm74_vm0, %v59_v7 }
  0x42   :  { %1176 = vmatprep.mubr.msk.f32.mxu0 %vm74_vm0, %v60_v9 }
  0x45   :  { %1177 = vmatmul.mubr.msk.f32.gmra.mrb[4].mxu0 %vm74_vm0, %v61_v10 }
  0x46   :  { %1179 = vmatprep.mubr.msk.f32.mxu0 %vm74_vm0, %v62_v11 }
  0x49   :  { %1180 = vmatmul.mubr.msk.f32.gmra.mrb[6].mxu0 %vm74_vm0, %v63_v12 }
  0x4a   :  { %1182 = vmatprep.mubr.msk.f32.mxu0 %vm74_vm0, %v64_v13 }
  0x4d   :  { %1183 = vmatmul.mubr.msk.f32.gmra.mrb[8].mxu0 %vm74_vm0, %v65_v14 }
  0x4e   :  { %1185 = vmatprep.mubr.msk.f32.mxu0 %vm74_vm0, %v66_v15 }
  0x51   :  { %1186 = vmatmul.mubr.msk.f32.gmra.mrb[10].mxu0 %vm74_vm0, %v67_v16 }
  0x52   :  { %1188 = vmatprep.mubr.msk.f32.mxu0 %vm74_vm0, %v68_v17 }
  0x55   :  { %1189 = vmatmul.mubr.msk.f32.gmra.mrb[12].mxu0 %vm74_vm0, %v69_v18 }
  0x56   :  { %1191 = vmatprep.mubr.msk.f32.mxu0 %vm74_vm0, %v70_v19 }
  0x59   :  { %1192 = vmatmul.mubr.msk.f32.gmra.mrb[14].mxu0 %vm74_vm0, %v71_v20 }
  0xb9   :  { %v1505_v21 = vpop.trf.xlu0 }
  0xba   :  { %1198 = vmatprep.mubr.msk.f32.mxu1 %vm74_vm0, %v1505_v21  ;;  %1238 = vmatprep.mubr.msk.f32.mxu0 %vm74_vm0, %v1505_v21 }
  0xbd   :  { %v1511_v22 = vpop.trf.xlu0 }
  0xc1   :  { %v1513_v26 = vpop.trf.xlu0 }
  0xc5   :  { %v289_v32 = vpop.trf.xlu0 }
 0x110   :  { %v1172_v23 = vpop.f32.mrb[0].mxu0 }
 0x111   :  { %v189_v24 = vpop.f32.mrb[1].mxu0 }
 0x112   :  { %v1278_v25 = vpack.c.bf16 %v1172_v23, %v189_v24 }
 0x114   :  { %v1175_v27 = vpop.f32.mrb[2].mxu0  ;;  %1279 = vmatprep.subr.bf16.mxu1 %v1278_v25 }
 0x115   :  { %v199_v28 = vpop.f32.mrb[3].mxu0  ;;  %1281 = vmatpush3.bf16.msra.mxu1 %v1278_v25 }
 0x116   :  { %v1282_v29 = vpack.c.bf16 %v1175_v27, %v199_v28 }
 0x118   :  { %v1178_v30 = vpop.f32.mrb[4].mxu0  ;;  %1199 = vmatmul.mubr.msk.f32.vlgmr.msra.gmra.mrb[0].mxu1 %vm74_vm0, %v1511_v22  ;;  %1283 = vmatprep.subr.bf16.mxu1 %v1282_v29 }
 0x119   :  { %v209_v31 = vpop.f32.mrb[5].mxu0  ;;  %1285 = vmatpush3.bf16.msra.mxu1 %v1282_v29  ;;  %1201 = vmatprep.mubr.msk.f32.mxu1 %vm74_vm0, %v1513_v26 }
 0x11a   :  { %v1286_v33 = vpack.c.bf16 %v1178_v30, %v209_v31 }
 0x11c   :  { %v1181_v34 = vpop.f32.mrb[6].mxu0  ;;  %1202 = vmatmul.mubr.msk.f32.gmra.mrb[2].mxu1 %vm74_vm0, %v289_v32  ;;  %1287 = vmatprep.subr.bf16.mxu1 %v1286_v33 }
 0x11d   :  { %v219_v35 = vpop.f32.mrb[7].mxu0  ;;  %1208 = vmatprep.mubr.msk.f32.mxu1 %vm74_vm0, %v1505_v21 }
 0x11e   :  { %v1290_v36 = vpack.c.bf16 %v1181_v34, %v219_v35 }
 0x120   :  { %v1184_v37 = vpop.f32.mrb[8].mxu0  ;;  %1209 = vmatmul.mubr.msk.f32.vlgmr.msra.gmra.mrb[4].mxu1 %vm74_vm0, %v1511_v22 }
 0x121   :  { %1289 = vmatpush3.bf16.msra.mxu1 %v1286_v33  ;;  %v229_v38 = vpop.f32.mrb[9].mxu0  ;;  %1211 = vmatprep.mubr.msk.f32.mxu1 %vm74_vm0, %v1513_v26 }
 0x122   :  { %v1294_v39 = vpack.c.bf16 %v1184_v37, %v229_v38  ;;  %1291 = vmatprep.subr.bf16.mxu1 %v1290_v36 }
 0x124   :  { %1212 = vmatmul.mubr.msk.f32.gmra.mrb[6].mxu1 %vm74_vm0, %v289_v32  ;;  %1295 = vmatprep.subr.bf16.mxu0 %v1294_v39  ;;  %v1187_v40 = vpop.f32.mrb[10].mxu0 }
 0x125   :  { %1218 = vmatprep.mubr.msk.f32.mxu1 %vm74_vm0, %v1505_v21  ;;  %1297 = vmatpush3.bf16.msra.mxu0 %v1294_v39  ;;  %v239_v41 = vpop.f32.mrb[11].mxu0 }
 0x126   :  { %v1298_v42 = vpack.c.bf16 %v1187_v40, %v239_v41 }
 0x128   :  { %v1190_v43 = vpop.f32.mrb[12].mxu0  ;;  %1219 = vmatmul.mubr.msk.f32.vlgmr.msra.gmra.mrb[8].mxu1 %vm74_vm0, %v1511_v22  ;;  %1239 = vmatmul.mubr.msk.f32.vlgmr.msra.gmra.mrb[16].mxu0 %vm74_vm0, %v1511_v22 }
 0x129   :  { %1293 = vmatpush3.bf16.msra.mxu1 %v1290_v36  ;;  %v249_v44 = vpop.f32.mrb[13].mxu0  ;;  %1221 = vmatprep.mubr.msk.f32.mxu1 %vm74_vm0, %v1513_v26 }
 0x12a   :  { %v1302_v45 = vpack.c.bf16 %v1190_v43, %v249_v44  ;;  %1241 = vmatprep.mubr.msk.f32.mxu0 %vm74_vm0, %v1513_v26  ;;  %1299 = vmatprep.subr.bf16.mxu1 %v1298_v42 }
 0x12c   :  { %1222 = vmatmul.mubr.msk.f32.gmra.mrb[10].mxu1 %vm74_vm0, %v289_v32  ;;  %1242 = vmatmul.mubr.msk.f32.gmra.mrb[18].mxu0 %vm74_vm0, %v289_v32  ;;  %v1193_v46 = vpop.f32.mrb[14].mxu0 }
 0x12d   :  { %1303 = vmatprep.subr.bf16.mxu0 %v1302_v45  ;;  %1228 = vmatprep.mubr.msk.f32.mxu1 %vm74_vm0, %v1505_v21  ;;  %v259_v47 = vpop.f32.mrb[15].mxu0 }
 0x12e   :  { %1305 = vmatpush3.bf16.msra.mxu0 %v1302_v45  ;;  %1258 = vmatprep.mubr.msk.f32.mxu0 %vm74_vm0, %v1505_v21  ;;  %v1306_v48 = vpack.c.bf16 %v1193_v46, %v259_v47 }
 0x130   :  { %1229 = vmatmul.mubr.msk.f32.vlgmr.msra.gmra.mrb[12].mxu1 %vm74_vm0, %v1511_v22 }
 0x131   :  { %1259 = vmatmul.mubr.msk.f32.vlgmr.msra.gmra.mrb[20].mxu0 %vm74_vm0, %v1511_v22  ;;  %1231 = vmatprep.mubr.msk.f32.mxu1 %vm74_vm0, %v1513_v26 }
 0x132   :  { %1261 = vmatprep.mubr.msk.f32.mxu0 %vm74_vm0, %v1513_v26  ;;  %1301 = vmatpush3.bf16.msra.mxu1 %v1298_v42 }
 0x133   :  { %1307 = vmatprep.subr.bf16.mxu1 %v1306_v48 }
 0x134   :  { %1232 = vmatmul.mubr.msk.f32.gmra.mrb[14].mxu1 %vm74_vm0, %v289_v32 }
 0x135   :  { %1262 = vmatmul.mubr.msk.f32.gmra.mrb[22].mxu0 %vm74_vm0, %v289_v32  ;;  %1248 = vmatprep.mubr.msk.f32.mxu1 %vm74_vm0, %v1505_v21 }
 0x138   :  { %1249 = vmatmul.mubr.msk.f32.vlgmr.msra.gmra.mrb[16].mxu1 %vm74_vm0, %v1511_v22 }
 0x139   :  { %1251 = vmatprep.mubr.msk.f32.mxu1 %vm74_vm0, %v1513_v26  ;;  %1309 = vmatpush3.bf16.msra.mxu1 %v1306_v48 }
 0x13c   :  { %1252 = vmatmul.mubr.msk.f32.gmra.mrb[18].mxu1 %vm74_vm0, %v289_v32 }
 0x13d   :  { %1268 = vmatprep.mubr.msk.f32.mxu1 %vm74_vm0, %v1505_v21 }
 0x140   :  { %1269 = vmatmul.mubr.msk.f32.vlgmr.msra.gmra.mrb[20].mxu1 %vm74_vm0, %v1511_v22 }
 0x141   :  { %1271 = vmatprep.mubr.msk.f32.mxu1 %vm74_vm0, %v1513_v26 }
 0x144   :  { %1272 = vmatmul.mubr.msk.f32.gmra.mrb[22].mxu1 %vm74_vm0, %v289_v32 }
 0x1eb   :  { %v1200_v49 = vpop.f32.mrb[0].mxu1 }
 0x1ec   :  { %401 = vst.msk [vmem:[#allocation8 + $0x8] sm:$0xff] %vm399_vm1, %v1200_v49  ;;  %v380_v50 = vpop.f32.mrb[1].mxu1 }
 0x1ed   :  { %400 = vst.msk [vmem:[#allocation8] sm:$0xff] %vm399_vm1, %v380_v50 }
 0x1ef   :  { %v1203_v51 = vpop.f32.mrb[2].mxu1 }
 0x1f0   :  { %403 = vst.msk [vmem:[#allocation8 + $0x18] sm:$0xff] %vm399_vm1, %v1203_v51  ;;  %v390_v52 = vpop.f32.mrb[3].mxu1 }
 0x1f1   :  { %402 = vst.msk [vmem:[#allocation8 + $0x10] sm:$0xff] %vm399_vm1, %v390_v52 }
 0x1f3   :  { %v1210_v53 = vpop.f32.mrb[4].mxu1 }
 0x1f4   :  { %491 = vst.msk [vmem:[#allocation8 + $0x28] sm:$0xff] %vm399_vm1, %v1210_v53  ;;  %v470_v54 = vpop.f32.mrb[5].mxu1 }
 0x1f5   :  { %490 = vst.msk [vmem:[#allocation8 + $0x20] sm:$0xff] %vm399_vm1, %v470_v54 }
 0x1f7   :  { %v1213_v55 = vpop.f32.mrb[6].mxu1 }
 0x1f8   :  { %493 = vst.msk [vmem:[#allocation8 + $0x38] sm:$0xff] %vm399_vm1, %v1213_v55  ;;  %v480_v56 = vpop.f32.mrb[7].mxu1 }
 0x1f9   :  { %492 = vst.msk [vmem:[#allocation8 + $0x30] sm:$0xff] %vm399_vm1, %v480_v56 }
 0x1fb   :  { %v1220_v57 = vpop.f32.mrb[8].mxu1  ;;  %v1240_v58 = vpop.f32.mrb[16].mxu0 }
 0x1fc   :  { %581 = vst.msk [vmem:[#allocation8 + $0x48] sm:$0xff] %vm399_vm1, %v1220_v57  ;;  %761 = vst.msk [vmem:[#allocation8 + $0x88] sm:$0xff] %vm399_vm1, %v1240_v58  ;;  %v560_v59 = vpop.f32.mrb[9].mxu1  ;;  %v740_v60 = vpop.f32.mrb[17].mxu0 }
 0x1fd   :  { %580 = vst.msk [vmem:[#allocation8 + $0x40] sm:$0xff] %vm399_vm1, %v560_v59  ;;  %760 = vst.msk [vmem:[#allocation8 + $0x80] sm:$0xff] %vm399_vm1, %v740_v60 }
 0x1ff   :  { %v1223_v61 = vpop.f32.mrb[10].mxu1  ;;  %v1243_v62 = vpop.f32.mrb[18].mxu0 }
 0x200   :  { %583 = vst.msk [vmem:[#allocation8 + $0x58] sm:$0xff] %vm399_vm1, %v1223_v61  ;;  %763 = vst.msk [vmem:[#allocation8 + $0x98] sm:$0xff] %vm399_vm1, %v1243_v62  ;;  %v570_v63 = vpop.f32.mrb[11].mxu1  ;;  %v750_v0 = vpop.f32.mrb[19].mxu0 }
 0x201   :  { %582 = vst.msk [vmem:[#allocation8 + $0x50] sm:$0xff] %vm399_vm1, %v570_v63  ;;  %762 = vst.msk [vmem:[#allocation8 + $0x90] sm:$0xff] %vm399_vm1, %v750_v0 }
 0x203   :  { %v1230_v1 = vpop.f32.mrb[12].mxu1 }
 0x204   :  { %671 = vst.msk [vmem:[#allocation8 + $0x68] sm:$0xff] %vm399_vm1, %v1230_v1  ;;  %v1260_v2 = vpop.f32.mrb[20].mxu0  ;;  %v650_v3 = vpop.f32.mrb[13].mxu1 }
 0x205   :  { %941 = vst.msk [vmem:[#allocation8 + $0xc8] sm:$0xff] %vm399_vm1, %v1260_v2  ;;  %670 = vst.msk [vmem:[#allocation8 + $0x60] sm:$0xff] %vm399_vm1, %v650_v3  ;;  %v920_v4 = vpop.f32.mrb[21].mxu0 }
 0x206   :  { %940 = vst.msk [vmem:[#allocation8 + $0xc0] sm:$0xff] %vm399_vm1, %v920_v4 }
 0x207   :  { %v1233_v5 = vpop.f32.mrb[14].mxu1 }
 0x208   :  { %673 = vst.msk [vmem:[#allocation8 + $0x78] sm:$0xff] %vm399_vm1, %v1233_v5  ;;  %v1263_v6 = vpop.f32.mrb[22].mxu0  ;;  %v660_v7 = vpop.f32.mrb[15].mxu1 }
 0x209   :  { %943 = vst.msk [vmem:[#allocation8 + $0xd8] sm:$0xff] %vm399_vm1, %v1263_v6  ;;  %672 = vst.msk [vmem:[#allocation8 + $0x70] sm:$0xff] %vm399_vm1, %v660_v7  ;;  %v930_v8 = vpop.f32.mrb[23].mxu0 }
 0x20a   :  { %942 = vst.msk [vmem:[#allocation8 + $0xd0] sm:$0xff] %vm399_vm1, %v930_v8 }
 0x20b   :  { %v1250_v9 = vpop.f32.mrb[16].mxu1 }
 0x20c   :  { %851 = vst.msk [vmem:[#allocation8 + $0xa8] sm:$0xff] %vm399_vm1, %v1250_v9  ;;  %v830_v10 = vpop.f32.mrb[17].mxu1 }
 0x20d   :  { %850 = vst.msk [vmem:[#allocation8 + $0xa0] sm:$0xff] %vm399_vm1, %v830_v10 }
 0x20f   :  { %v1253_v11 = vpop.f32.mrb[18].mxu1 }
 0x210   :  { %853 = vst.msk [vmem:[#allocation8 + $0xb8] sm:$0xff] %vm399_vm1, %v1253_v11  ;;  %v840_v12 = vpop.f32.mrb[19].mxu1 }
 0x211   :  { %852 = vst.msk [vmem:[#allocation8 + $0xb0] sm:$0xff] %vm399_vm1, %v840_v12 }
 0x213   :  { %v1270_v13 = vpop.f32.mrb[20].mxu1 }
 0x214   :  { %1031 = vst.msk [vmem:[#allocation8 + $0xe8] sm:$0xff] %vm399_vm1, %v1270_v13  ;;  %v1010_v14 = vpop.f32.mrb[21].mxu1 }
 0x215   :  { %1030 = vst.msk [vmem:[#allocation8 + $0xe0] sm:$0xff] %vm399_vm1, %v1010_v14 }
 0x217   :  { %v1273_v15 = vpop.f32.mrb[22].mxu1 }
 0x218   :  { %1033 = vst.msk [vmem:[#allocation8 + $0xf8] sm:$0xff] %vm399_vm1, %v1273_v15  ;;  %v1020_v16 = vpop.f32.mrb[23].mxu1 }
 0x219   :  { %1032 = vst.msk [vmem:[#allocation8 + $0xf0] sm:$0xff] %vm399_vm1, %v1020_v16 }
 0x21a   :  { %1394 = shalt.err (!%p1391_p0)
}
 0x21b   :  { %s1395_s27 = scalar_lea.hbm %s1617_s3, 4096 }
 0x21c   :  { %p1396_p1 = scmp.ne.s32.totalorder %s1617_s3, %s1395_s27  ;;  %p1399_p2 = scmp.lt.u32.totalorder %s1395_s27, %s1617_s3 }
 0x21e   :  { %p1401_p3 = pnand %p1399_p2, %p1396_p1 }
 0x220   :  { %1404 = shalt.err (!%p1401_p3)
}
 0x221   :  { %1045 = dma.vmem_to_hbm [thread:$0]  %s1040_s21, 4096, %s1617_s3, [#allocation4], %s1413_s24, %s1413_s24, %s1414_s25  }
 0x222   :  { %1409 = dma.done.wait [#allocation4], 4096  }
 0x223   :  { %1410 = vsyncadd [#allocation4], 4294963200 }
 0x224   :  { %1049 = vsyncpa [#allocation3], 1 }
 0x225   :  { %1050 = vsyncpa [#allocation6], 1 }
 0x226   :  { %1051 = vsyncpa [#allocation4], 1 }

</bundles_post_ra>
